<compile_context>
chip_gen: v7x
topology: tpu7x:2x2x1
jax: 0.10.0
libtpu: 0.0.40
codegen_flags: <defaults>
</compile_context>

<pallas_src>
import functools
import math

import jax
import jax.numpy as jnp
from jax.experimental import pallas as pl
from jax.experimental.pallas import tpu as pltpu


# ---------------------------------------------------------------------------
# Kernel
# ---------------------------------------------------------------------------
def _patch_merging_kernel(x_ref, w_ref, s_ref, b_ref, o_ref, *, eps, k, c, mxu_dtype):
    """One row tile.

    x_ref: (tile, k*8C)  k merged patches packed per kernel row (lane-dense)
    w_ref: (k*8C, k*C)   block-diagonal reduction weight, LayerNorm gamma folded in
    s_ref: (1, k*C)      per-block column sums of the folded weight (f32)
    b_ref: (1, k*C)      beta @ W^T, tiled k times (f32)
    o_ref: (tile, k*C)
    """
    c8 = 8 * c
    x = x_ref[...]
    tile = x.shape[0]

    # One well-shaped MXU call on the raw activations (bf16 in, f32 accumulation).
    acc = jnp.dot(x.astype(mxu_dtype), w_ref[...], preferred_element_type=jnp.float32)

    # Per-chunk LayerNorm statistics, single pass in f32.
    means, inv_stds = [], []
    for j in range(k):                                   # k in {1..16}; unrolled at trace time
        xj = x[:, j * c8:(j + 1) * c8].astype(jnp.float32)
        mu = jnp.mean(xj, axis=-1, keepdims=True)
        mu2 = jnp.mean(xj * xj, axis=-1, keepdims=True)
        var = jnp.maximum(mu2 - mu * mu, 0.0)            # clamp: single-pass var can go slightly <0
        means.append(mu)
        inv_stds.append(jax.lax.rsqrt(var + eps))

    if k == 1:
        mean_f, inv_f = means[0], inv_stds[0]            # (tile, 1) broadcasts over (tile, C)
    else:
        # Broadcast each chunk's per-row scalars across its C output columns.
        col = jax.lax.broadcasted_iota(jnp.int32, (tile, k * c), 1)
        mean_f = jnp.zeros((tile, k * c), jnp.float32)
        inv_f = jnp.zeros((tile, k * c), jnp.float32)
        for j in range(k):
            sel = (col >= j * c) & (col < (j + 1) * c)
            mean_f = jnp.where(sel, means[j], mean_f)
            inv_f = jnp.where(sel, inv_stds[j], inv_f)

    # Deferred normalization:  inv_std * (x @ W' - mean * colsum(W')) + beta @ W^T
    out = inv_f * (acc - mean_f * s_ref[...]) + b_ref[...]
    o_ref[...] = out.astype(o_ref.dtype)


# ---------------------------------------------------------------------------
# Tiling helpers
# ---------------------------------------------------------------------------
def _vmem_capacity_bytes():
    try:
        cap = getattr(pltpu.get_tpu_info(), "vmem_capacity_bytes", None)
        if cap:
            return int(cap)
    except Exception:
        pass
    return 64 << 20   # conservative fallback: fits every current generation (v7x-sized)


def _pick_tile_rows(n_rows, per_row_bytes, budget_bytes, sublane, *,
                    min_steps=8, max_tile=2048):
    """Row tile: as large as the VMEM budget allows, but capped at ~n_rows/min_steps so the
    grid keeps multiple steps (DMA/compute overlap, and both v7x TensorCores get work)."""
    budget_tile = int(max(budget_bytes, 0) // max(per_row_bytes, 1))
    step_cap = -(-n_rows // min_steps)                  # cdiv(n_rows, min_steps)
    step_cap = -(-step_cap // sublane) * sublane        # round up to the sublane multiple
    tile = min(budget_tile, step_cap, max_tile)
    tile -= tile % sublane
    return max(sublane, tile)


def _supports_single_buffering():
    try:
        pl.BlockSpec((8, 128), lambda i: (0, 0), pipeline_mode=pl.Buffered(1))
        return True
    except Exception:
        return False


_SINGLE_BUFFER_OK = _supports_single_buffering()


# ---------------------------------------------------------------------------
# Wrapper
# ---------------------------------------------------------------------------
def patch_merging(x, gamma, beta, w_reduction, *, eps=1e-5,
                  mxu_dtype=jnp.bfloat16, stream_dtype=None):
    """Pallas implementation of PatchMerging.forward.

    x:            (B, L, C), L % 8 == 0
    gamma, beta:  (8*C,)    LayerNorm affine
    w_reduction:  (C, 8*C)  nn.Linear weight (out_features, in_features), bias-free
    mxu_dtype:    dtype used on the MXU (bf16 recommended on all generations)
    stream_dtype: optionally down-cast x before streaming (e.g. bf16 on v5e -> half HBM bytes)
    """
    B, L, C = x.shape
    assert L % 8 == 0, "L must be a multiple of 8"
    out_dtype = x.dtype
    if stream_dtype is not None:
        x = x.astype(stream_dtype)
    C8 = 8 * C
    M = B * (L // 8)

    # ---- per-generation VMEM budget ----------------------------------------------------
    vmem_cap = _vmem_capacity_bytes()
    # ~108 MiB on v5e/v6e (128 MiB physical), ~52 MiB on v7x (64 MiB physical)
    vmem_limit = max(32 << 20, min(int(0.85 * vmem_cap), vmem_cap - (12 << 20)))

    # ---- lane packing -------------------------------------------------------------------
    w_item = jnp.dtype(mxu_dtype).itemsize
    k = 128 // math.gcd(C, 128)
    if k > 1 and (k * C8) * (k * C) * w_item > min(16 << 20, vmem_limit // 4):
        # TODO(synk): tile the packed weight along NC with a second grid axis instead of
        # dropping lane packing for very large channel counts that are not multiples of 128.
        k = 1
    K, NC = k * C8, k * C

    # ---- fold LayerNorm affine into the reduction weight (constant-folded under jit) ----
    w_t = w_reduction.astype(jnp.float32).T                        # (8C, C)
    w_fold = w_t * gamma.astype(jnp.float32)[:, None]              # gamma folded into rows
    b_fold = beta.astype(jnp.float32) @ w_t                        # (C,)
    s_fold = jnp.sum(w_fold, axis=0)                               # 1^T W'  (C,)
    if k > 1:
        w_big = jnp.kron(jnp.eye(k, dtype=jnp.float32), w_fold)    # (K, NC), block diagonal
        b_big = jnp.tile(b_fold, k)
        s_big = jnp.tile(s_fold, k)
    else:
        w_big, b_big, s_big = w_fold, b_fold, s_fold
    w_big = w_big.astype(mxu_dtype)                                # guaranteed bf16 MXU path
    b_big = b_big.reshape(1, NC).astype(jnp.float32)
    s_big = s_big.reshape(1, NC).astype(jnp.float32)
    w_bytes = K * NC * w_item

    x_item = jnp.dtype(x.dtype).itemsize
    out_item = jnp.dtype(out_dtype).itemsize
    sublane = 8 * max(1, 4 // max(x_item, 1))          # 8 (f32) / 16 (bf16) / 32 (int8)
    n_rows = -(-M // k)                                # packed kernel rows (ceil(M / k))

    x_m = x.reshape(M, C8)                             # strided slice + concat == reshape

    kernel = functools.partial(_patch_merging_kernel, eps=eps, k=k, c=C, mxu_dtype=mxu_dtype)

    def run(want_single_buffer):
        single = want_single_buffer and _SINGLE_BUFFER_OK
        weight_bufs = 1 if single else 2
        # per-row VMEM: double-buffered streams + in-kernel intermediates
        per_row = (2 * K * x_item            # input stream (double-buffered)
                   + 2 * NC * out_item       # output stream (double-buffered)
                   + K * w_item              # bf16 copy of the tile fed to the MXU
                   + 2 * C8 * 4              # f32 per-chunk stat temporaries
                   + 4 * NC * 4)             # f32 acc / mean / inv_std / out
        fixed = weight_bufs * w_bytes + 4 * NC * 4 + (8 << 20)   # params + compiler headroom
        tile = _pick_tile_rows(n_rows, per_row, vmem_limit - fixed, sublane)

        m_pad = -(-n_rows // tile) * tile
        xk = x_m
        if m_pad * k != M:
            # padded zero rows produce finite bias-only values and are sliced off below
            xk = jnp.pad(x_m, ((0, m_pad * k - M), (0, 0)))
        xk = xk.reshape(m_pad, K)                      # lane packing == free reshape

        const_kwargs = {}
        if single:
            const_kwargs["pipeline_mode"] = pl.Buffered(1)   # params never change -> 1 buffer

        out = pl.pallas_call(
            kernel,
            out_shape=jax.ShapeDtypeStruct((m_pad, NC), out_dtype),
            grid_spec=pltpu.PrefetchScalarGridSpec(
                num_scalar_prefetch=0,
                grid=(m_pad // tile,),
                in_specs=[
                    pl.BlockSpec((tile, K), lambda i: (i, 0)),
                    pl.BlockSpec((K, NC), lambda i: (0, 0), **const_kwargs),
                    pl.BlockSpec((1, NC), lambda i: (0, 0), **const_kwargs),
                    pl.BlockSpec((1, NC), lambda i: (0, 0), **const_kwargs),
                ],
                out_specs=pl.BlockSpec((tile, NC), lambda i: (i, 0)),
            ),
            compiler_params=pltpu.CompilerParams(
                dimension_semantics=("parallel",),     # megacore / v7x dual-TC sharding
                vmem_limit_bytes=int(vmem_limit),
            ),
        )(xk, w_big, s_big, b_big)
        # unpack lanes back to merged rows and drop padding (do NOT remove this slice)
        return out.reshape(-1, C)[:M]

    try:
        out2d = run(True)
    except Exception:
        # pipeline_mode / Buffered(1) not supported on this JAX build: fall back to the
        # default double-buffered parameter blocks (correct, slightly more VMEM).
        out2d = run(False)

    return out2d.reshape(B, L // 8, C)


# ---------------------------------------------------------------------------
# Pure-JAX reference (matches the PyTorch forward)
# ---------------------------------------------------------------------------
def patch_merging_ref(x, gamma, beta, w_reduction, eps=1e-5):
    B, L, C = x.shape
    xm = x.reshape(B, L // 8, 8 * C).astype(jnp.float32)   # == strided slice + concat
    mean = jnp.mean(xm, axis=-1, keepdims=True)
    var = jnp.mean((xm - mean) ** 2, axis=-1, keepdims=True)
    xn = (xm - mean) / jnp.sqrt(var + eps)
    y = xn * gamma.astype(jnp.float32) + beta.astype(jnp.float32)
    return y @ w_reduction.T.astype(jnp.float32)


# ---------------------------------------------------------------------------
# Demo / self-test
# ---------------------------------------------------------------------------
def _run_case(key, B, L, C, *, mxu_dtype=jnp.bfloat16, stream_dtype=None, tol=3e-2):
    kx, kg, kb, kw = jax.random.split(key, 4)
    x = jax.random.normal(kx, (B, L, C), dtype=jnp.float32)
    gamma = 1.0 + 0.02 * jax.random.normal(kg, (8 * C,), dtype=jnp.float32)
    beta = 0.01 * jax.random.normal(kb, (8 * C,), dtype=jnp.float32)
    w = jax.random.normal(kw, (C, 8 * C), dtype=jnp.float32) / jnp.sqrt(8.0 * C)

    out = jax.block_until_ready(
        patch_merging(x, gamma, beta, w, mxu_dtype=mxu_dtype, stream_dtype=stream_dtype))

    x_for_ref = x if stream_dtype is None else x.astype(stream_dtype).astype(jnp.float32)
    ref = patch_merging_ref(x_for_ref, gamma, beta, w)
    assert out.shape == (B, L // 8, C), out.shape
    err = float(jnp.max(jnp.abs(out.astype(jnp.float32) - ref)))
    assert bool(jnp.allclose(out.astype(jnp.float32), ref, atol=tol, rtol=tol)), (
        f"mismatch vs reference (C={C}, mxu={mxu_dtype}): max abs err {err:.3e}")
    return out


if __name__ == "__main__":
    key = jax.random.PRNGKey(0)
    k1, k2, k3, k4 = jax.random.split(key, 4)
    # lane-packed path (C=32 -> k=4 -> 128-lane-dense I/O), bf16 MXU
    _run_case(k1, B=2, L=64, C=32, tol=3e-2)
    # C already a multiple of 128 -> k=1 path, bf16 MXU
    _run_case(k2, B=2, L=64, C=128, tol=3e-2)
    # tight-tolerance check of the fused algebra on the f32 MXU path
    _run_case(k3, B=2, L=64, C=32, mxu_dtype=jnp.float32, tol=2e-3)
    # bf16-streamed activations (halves HBM bytes; the v5e recommendation)
    _run_case(k4, B=2, L=64, C=32, stream_dtype=jnp.bfloat16, tol=3e-2)
    print("KERNEL_OK")
</pallas_src>

<mosaic_0001>
module attributes {stable_mosaic.version = 11 : i64} {
  func.func @_patch_merging_kernel(%arg0: i32, %arg1: memref<8x1024xf32, #tpu.memory_space<vmem>>, %arg2: memref<1024x128xbf16, #tpu.memory_space<vmem>>, %arg3: memref<1x128xf32, #tpu.memory_space<vmem>>, %arg4: memref<1x128xf32, #tpu.memory_space<vmem>>, %arg5: memref<8x128xf32, #tpu.memory_space<vmem>>) attributes {dimension_semantics = [#tpu.dimension_semantics<parallel>], iteration_bounds = array<i64: 1>, scalar_prefetch = 0 : i64, scratch_operands = 0 : i64, tpu.core_type = #tpu.core_type<tc>, window_params = [{transform_indices = @transform_0, window_bounds = array<i64: 8, 1024>}, {pipeline_mode = #tpu.pipeline_mode<synchronous>, transform_indices = @transform_1, window_bounds = array<i64: 1024, 128>}, {pipeline_mode = #tpu.pipeline_mode<synchronous>, transform_indices = @transform_2, window_bounds = array<i64: 1, 128>}, {pipeline_mode = #tpu.pipeline_mode<synchronous>, transform_indices = @transform_3, window_bounds = array<i64: 1, 128>}, {transform_indices = @transform_4, window_bounds = array<i64: 8, 128>}]} {
    %c0 = arith.constant 0 : index
    %c0_0 = arith.constant 0 : index
    %0 = vector.load %arg1[%c0, %c0_0] : memref<8x1024xf32, #tpu.memory_space<vmem>>, vector<8x1024xf32>
    %1 = arith.truncf %0 : vector<8x1024xf32> to vector<8x1024xbf16>
    %c0_1 = arith.constant 0 : index
    %c0_2 = arith.constant 0 : index
    %2 = vector.load %arg2[%c0_1, %c0_2] : memref<1024x128xbf16, #tpu.memory_space<vmem>>, vector<1024x128xbf16>
    %cst = arith.constant dense<0.000000e+00> : vector<8x128xf32>
    %3 = tpu.matmul %1, %2, %cst {dimension_numbers = #tpu.dot_dimension_numbers<[1], [0], [0], [1], [0, 0, 1, 1], [], []>} : vector<8x1024xbf16>, vector<1024x128xbf16>, vector<8x128xf32> -> vector<8x128xf32>
    %4 = vector.extract_strided_slice %0 {offsets = [0, 0], sizes = [8, 256], strides = [1, 1]} : vector<8x1024xf32> to vector<8x256xf32>
    %cst_3 = arith.constant dense<0.000000e+00> : vector<8xf32>
    %5 = vector.multi_reduction <add>, %4, %cst_3 [1] : vector<8x256xf32> to vector<8xf32>
    %6 = vector.shape_cast %5 : vector<8xf32> to vector<8x1xf32>
    %cst_4 = arith.constant 2.560000e+02 : f32
    %7 = vector.broadcast %cst_4 : f32 to vector<8x1xf32>
    %8 = arith.divf %6, %7 : vector<8x1xf32>
    %9 = arith.mulf %4, %4 : vector<8x256xf32>
    %cst_5 = arith.constant dense<0.000000e+00> : vector<8xf32>
    %10 = vector.multi_reduction <add>, %9, %cst_5 [1] : vector<8x256xf32> to vector<8xf32>
    %11 = vector.shape_cast %10 : vector<8xf32> to vector<8x1xf32>
    %cst_6 = arith.constant 2.560000e+02 : f32
    %12 = vector.broadcast %cst_6 : f32 to vector<8x1xf32>
    %13 = arith.divf %11, %12 : vector<8x1xf32>
    %14 = arith.mulf %8, %8 : vector<8x1xf32>
    %15 = arith.subf %13, %14 : vector<8x1xf32>
    %cst_7 = arith.constant 0.000000e+00 : f32
    %16 = vector.broadcast %cst_7 : f32 to vector<8x1xf32>
    %17 = arith.maximumf %15, %16 : vector<8x1xf32>
    %cst_8 = arith.constant 9.99999974E-6 : f32
    %18 = vector.broadcast %cst_8 : f32 to vector<8x1xf32>
    %19 = arith.addf %17, %18 : vector<8x1xf32>
    %20 = math.rsqrt %19 : vector<8x1xf32>
    %21 = vector.extract_strided_slice %0 {offsets = [0, 256], sizes = [8, 256], strides = [1, 1]} : vector<8x1024xf32> to vector<8x256xf32>
    %cst_9 = arith.constant dense<0.000000e+00> : vector<8xf32>
    %22 = vector.multi_reduction <add>, %21, %cst_9 [1] : vector<8x256xf32> to vector<8xf32>
    %23 = vector.shape_cast %22 : vector<8xf32> to vector<8x1xf32>
    %cst_10 = arith.constant 2.560000e+02 : f32
    %24 = vector.broadcast %cst_10 : f32 to vector<8x1xf32>
    %25 = arith.divf %23, %24 : vector<8x1xf32>
    %26 = arith.mulf %21, %21 : vector<8x256xf32>
    %cst_11 = arith.constant dense<0.000000e+00> : vector<8xf32>
    %27 = vector.multi_reduction <add>, %26, %cst_11 [1] : vector<8x256xf32> to vector<8xf32>
    %28 = vector.shape_cast %27 : vector<8xf32> to vector<8x1xf32>
    %cst_12 = arith.constant 2.560000e+02 : f32
    %29 = vector.broadcast %cst_12 : f32 to vector<8x1xf32>
    %30 = arith.divf %28, %29 : vector<8x1xf32>
    %31 = arith.mulf %25, %25 : vector<8x1xf32>
    %32 = arith.subf %30, %31 : vector<8x1xf32>
    %cst_13 = arith.constant 0.000000e+00 : f32
    %33 = vector.broadcast %cst_13 : f32 to vector<8x1xf32>
    %34 = arith.maximumf %32, %33 : vector<8x1xf32>
    %cst_14 = arith.constant 9.99999974E-6 : f32
    %35 = vector.broadcast %cst_14 : f32 to vector<8x1xf32>
    %36 = arith.addf %34, %35 : vector<8x1xf32>
    %37 = math.rsqrt %36 : vector<8x1xf32>
    %38 = vector.extract_strided_slice %0 {offsets = [0, 512], sizes = [8, 256], strides = [1, 1]} : vector<8x1024xf32> to vector<8x256xf32>
    %cst_15 = arith.constant dense<0.000000e+00> : vector<8xf32>
    %39 = vector.multi_reduction <add>, %38, %cst_15 [1] : vector<8x256xf32> to vector<8xf32>
    %40 = vector.shape_cast %39 : vector<8xf32> to vector<8x1xf32>
    %cst_16 = arith.constant 2.560000e+02 : f32
    %41 = vector.broadcast %cst_16 : f32 to vector<8x1xf32>
    %42 = arith.divf %40, %41 : vector<8x1xf32>
    %43 = arith.mulf %38, %38 : vector<8x256xf32>
    %cst_17 = arith.constant dense<0.000000e+00> : vector<8xf32>
    %44 = vector.multi_reduction <add>, %43, %cst_17 [1] : vector<8x256xf32> to vector<8xf32>
    %45 = vector.shape_cast %44 : vector<8xf32> to vector<8x1xf32>
    %cst_18 = arith.constant 2.560000e+02 : f32
    %46 = vector.broadcast %cst_18 : f32 to vector<8x1xf32>
    %47 = arith.divf %45, %46 : vector<8x1xf32>
    %48 = arith.mulf %42, %42 : vector<8x1xf32>
    %49 = arith.subf %47, %48 : vector<8x1xf32>
    %cst_19 = arith.constant 0.000000e+00 : f32
    %50 = vector.broadcast %cst_19 : f32 to vector<8x1xf32>
    %51 = arith.maximumf %49, %50 : vector<8x1xf32>
    %cst_20 = arith.constant 9.99999974E-6 : f32
    %52 = vector.broadcast %cst_20 : f32 to vector<8x1xf32>
    %53 = arith.addf %51, %52 : vector<8x1xf32>
    %54 = math.rsqrt %53 : vector<8x1xf32>
    %55 = vector.extract_strided_slice %0 {offsets = [0, 768], sizes = [8, 256], strides = [1, 1]} : vector<8x1024xf32> to vector<8x256xf32>
    %cst_21 = arith.constant dense<0.000000e+00> : vector<8xf32>
    %56 = vector.multi_reduction <add>, %55, %cst_21 [1] : vector<8x256xf32> to vector<8xf32>
    %57 = vector.shape_cast %56 : vector<8xf32> to vector<8x1xf32>
    %cst_22 = arith.constant 2.560000e+02 : f32
    %58 = vector.broadcast %cst_22 : f32 to vector<8x1xf32>
    %59 = arith.divf %57, %58 : vector<8x1xf32>
    %60 = arith.mulf %55, %55 : vector<8x256xf32>
    %cst_23 = arith.constant dense<0.000000e+00> : vector<8xf32>
    %61 = vector.multi_reduction <add>, %60, %cst_23 [1] : vector<8x256xf32> to vector<8xf32>
    %62 = vector.shape_cast %61 : vector<8xf32> to vector<8x1xf32>
    %cst_24 = arith.constant 2.560000e+02 : f32
    %63 = vector.broadcast %cst_24 : f32 to vector<8x1xf32>
    %64 = arith.divf %62, %63 : vector<8x1xf32>
    %65 = arith.mulf %59, %59 : vector<8x1xf32>
    %66 = arith.subf %64, %65 : vector<8x1xf32>
    %cst_25 = arith.constant 0.000000e+00 : f32
    %67 = vector.broadcast %cst_25 : f32 to vector<8x1xf32>
    %68 = arith.maximumf %66, %67 : vector<8x1xf32>
    %cst_26 = arith.constant 9.99999974E-6 : f32
    %69 = vector.broadcast %cst_26 : f32 to vector<8x1xf32>
    %70 = arith.addf %68, %69 : vector<8x1xf32>
    %71 = math.rsqrt %70 : vector<8x1xf32>
    %72 = tpu.iota {dimensions = array<i32: 1>} : vector<8x128xi32>
    %cst_27 = arith.constant 0.000000e+00 : f32
    %73 = vector.broadcast %cst_27 : f32 to vector<8x128xf32>
    %cst_28 = arith.constant 0.000000e+00 : f32
    %74 = vector.broadcast %cst_28 : f32 to vector<8x128xf32>
    %c0_i32 = arith.constant 0 : i32
    %75 = vector.broadcast %c0_i32 : i32 to vector<8x128xi32>
    %76 = arith.cmpi sge, %72, %75 : vector<8x128xi32>
    %c32_i32 = arith.constant 32 : i32
    %77 = vector.broadcast %c32_i32 : i32 to vector<8x128xi32>
    %78 = arith.cmpi slt, %72, %77 : vector<8x128xi32>
    %79 = arith.andi %76, %78 : vector<8x128xi1>
    %80 = vector.shape_cast %8 : vector<8x1xf32> to vector<8x1xf32>
    %81 = vector.broadcast %80 : vector<8x1xf32> to vector<8x128xf32>
    %82 = arith.select %79, %81, %73 : vector<8x128xi1>, vector<8x128xf32>
    %83 = vector.shape_cast %20 : vector<8x1xf32> to vector<8x1xf32>
    %84 = vector.broadcast %83 : vector<8x1xf32> to vector<8x128xf32>
    %85 = arith.select %79, %84, %74 : vector<8x128xi1>, vector<8x128xf32>
    %c32_i32_29 = arith.constant 32 : i32
    %86 = vector.broadcast %c32_i32_29 : i32 to vector<8x128xi32>
    %87 = arith.cmpi sge, %72, %86 : vector<8x128xi32>
    %c64_i32 = arith.constant 64 : i32
    %88 = vector.broadcast %c64_i32 : i32 to vector<8x128xi32>
    %89 = arith.cmpi slt, %72, %88 : vector<8x128xi32>
    %90 = arith.andi %87, %89 : vector<8x128xi1>
    %91 = vector.shape_cast %25 : vector<8x1xf32> to vector<8x1xf32>
    %92 = vector.broadcast %91 : vector<8x1xf32> to vector<8x128xf32>
    %93 = arith.select %90, %92, %82 : vector<8x128xi1>, vector<8x128xf32>
    %94 = vector.shape_cast %37 : vector<8x1xf32> to vector<8x1xf32>
    %95 = vector.broadcast %94 : vector<8x1xf32> to vector<8x128xf32>
    %96 = arith.select %90, %95, %85 : vector<8x128xi1>, vector<8x128xf32>
    %c64_i32_30 = arith.constant 64 : i32
    %97 = vector.broadcast %c64_i32_30 : i32 to vector<8x128xi32>
    %98 = arith.cmpi sge, %72, %97 : vector<8x128xi32>
    %c96_i32 = arith.constant 96 : i32
    %99 = vector.broadcast %c96_i32 : i32 to vector<8x128xi32>
    %100 = arith.cmpi slt, %72, %99 : vector<8x128xi32>
    %101 = arith.andi %98, %100 : vector<8x128xi1>
    %102 = vector.shape_cast %42 : vector<8x1xf32> to vector<8x1xf32>
    %103 = vector.broadcast %102 : vector<8x1xf32> to vector<8x128xf32>
    %104 = arith.select %101, %103, %93 : vector<8x128xi1>, vector<8x128xf32>
    %105 = vector.shape_cast %54 : vector<8x1xf32> to vector<8x1xf32>
    %106 = vector.broadcast %105 : vector<8x1xf32> to vector<8x128xf32>
    %107 = arith.select %101, %106, %96 : vector<8x128xi1>, vector<8x128xf32>
    %c96_i32_31 = arith.constant 96 : i32
    %108 = vector.broadcast %c96_i32_31 : i32 to vector<8x128xi32>
    %109 = arith.cmpi sge, %72, %108 : vector<8x128xi32>
    %c128_i32 = arith.constant 128 : i32
    %110 = vector.broadcast %c128_i32 : i32 to vector<8x128xi32>
    %111 = arith.cmpi slt, %72, %110 : vector<8x128xi32>
    %112 = arith.andi %109, %111 : vector<8x128xi1>
    %113 = vector.shape_cast %59 : vector<8x1xf32> to vector<8x1xf32>
    %114 = vector.broadcast %113 : vector<8x1xf32> to vector<8x128xf32>
    %115 = arith.select %112, %114, %104 : vector<8x128xi1>, vector<8x128xf32>
    %116 = vector.shape_cast %71 : vector<8x1xf32> to vector<8x1xf32>
    %117 = vector.broadcast %116 : vector<8x1xf32> to vector<8x128xf32>
    %118 = arith.select %112, %117, %107 : vector<8x128xi1>, vector<8x128xf32>
    %c0_32 = arith.constant 0 : index
    %c0_33 = arith.constant 0 : index
    %119 = vector.load %arg3[%c0_32, %c0_33] : memref<1x128xf32, #tpu.memory_space<vmem>>, vector<1x128xf32>
    %120 = vector.broadcast %119 : vector<1x128xf32> to vector<8x128xf32>
    %121 = arith.mulf %115, %120 : vector<8x128xf32>
    %122 = arith.subf %3, %121 : vector<8x128xf32>
    %123 = arith.mulf %118, %122 : vector<8x128xf32>
    %c0_34 = arith.constant 0 : index
    %c0_35 = arith.constant 0 : index
    %124 = vector.load %arg4[%c0_34, %c0_35] : memref<1x128xf32, #tpu.memory_space<vmem>>, vector<1x128xf32>
    %125 = vector.broadcast %124 : vector<1x128xf32> to vector<8x128xf32>
    %126 = arith.addf %123, %125 : vector<8x128xf32>
    %c0_36 = arith.constant 0 : index
    %c0_37 = arith.constant 0 : index
    %127 = vector.load %arg5[%c0_36, %c0_37] : memref<8x128xf32, #tpu.memory_space<vmem>>, vector<8x128xf32>
    tpu.vector_store %arg5[%c0_36, %c0_37], %126 {strides = array<i32>} : memref<8x128xf32, #tpu.memory_space<vmem>>, vector<8x128xf32>,
    return
  }
  func.func @transform_0(%arg0: i32) -> (i32, i32) {
    %c0_i32 = arith.constant 0 : i32
    %c0_i32_0 = arith.constant 0 : i32
    return %arg0, %c0_i32 : i32, i32
  }
  func.func @transform_1(%arg0: i32) -> (i32, i32) {
    %c0_i32 = arith.constant 0 : i32
    %c0_i32_0 = arith.constant 0 : i32
    %c0_i32_1 = arith.constant 0 : i32
    return %c0_i32, %c0_i32_0 : i32, i32
  }
  func.func @transform_2(%arg0: i32) -> (i32, i32) {
    %c0_i32 = arith.constant 0 : i32
    %c0_i32_0 = arith.constant 0 : i32
    %c0_i32_1 = arith.constant 0 : i32
    return %c0_i32, %c0_i32_0 : i32, i32
  }
  func.func @transform_3(%arg0: i32) -> (i32, i32) {
    %c0_i32 = arith.constant 0 : i32
    %c0_i32_0 = arith.constant 0 : i32
    %c0_i32_1 = arith.constant 0 : i32
    return %c0_i32, %c0_i32_0 : i32, i32
  }
  func.func @transform_4(%arg0: i32) -> (i32, i32) {
    %c0_i32 = arith.constant 0 : i32
    %c0_i32_0 = arith.constant 0 : i32
    return %arg0, %c0_i32 : i32, i32
  }
}

module attributes {stable_mosaic.version = 11 : i64} {
  func.func @_patch_merging_kernel(%arg0: i32, %arg1: memref<8x1024xf32, #tpu.memory_space<vmem>>, %arg2: memref<1024x128xbf16, #tpu.memory_space<vmem>>, %arg3: memref<1x128xf32, #tpu.memory_space<vmem>>, %arg4: memref<1x128xf32, #tpu.memory_space<vmem>>, %arg5: memref<8x128xf32, #tpu.memory_space<vmem>>) attributes {dimension_semantics = [#tpu.dimension_semantics<parallel>], iteration_bounds = array<i64: 1>, scalar_prefetch = 0 : i64, scratch_operands = 0 : i64, tpu.core_type = #tpu.core_type<tc>, window_params = [{transform_indices = @transform_0, window_bounds = array<i64: 8, 1024>}, {pipeline_mode = #tpu.pipeline_mode<synchronous>, transform_indices = @transform_1, window_bounds = array<i64: 1024, 128>}, {pipeline_mode = #tpu.pipeline_mode<synchronous>, transform_indices = @transform_2, window_bounds = array<i64: 1, 128>}, {pipeline_mode = #tpu.pipeline_mode<synchronous>, transform_indices = @transform_3, window_bounds = array<i64: 1, 128>}, {transform_indices = @transform_4, window_bounds = array<i64: 8, 128>}]} {
    %c0 = arith.constant 0 : index
    %c0_0 = arith.constant 0 : index
    %0 = vector.load %arg1[%c0, %c0_0] : memref<8x1024xf32, #tpu.memory_space<vmem>>, vector<8x1024xf32>
    %1 = arith.truncf %0 : vector<8x1024xf32> to vector<8x1024xbf16>
    %c0_1 = arith.constant 0 : index
    %c0_2 = arith.constant 0 : index
    %2 = vector.load %arg2[%c0_1, %c0_2] : memref<1024x128xbf16, #tpu.memory_space<vmem>>, vector<1024x128xbf16>
    %cst = arith.constant dense<0.000000e+00> : vector<8x128xf32>
    %3 = tpu.matmul %1, %2, %cst {dimension_numbers = #tpu.dot_dimension_numbers<[1], [0], [0], [1], [0, 0, 1, 1], [], []>} : vector<8x1024xbf16>, vector<1024x128xbf16>, vector<8x128xf32> -> vector<8x128xf32>
    %4 = vector.extract_strided_slice %0 {offsets = [0, 0], sizes = [8, 256], strides = [1, 1]} : vector<8x1024xf32> to vector<8x256xf32>
    %cst_3 = arith.constant dense<0.000000e+00> : vector<8xf32>
    %5 = vector.multi_reduction <add>, %4, %cst_3 [1] : vector<8x256xf32> to vector<8xf32>
    %6 = vector.shape_cast %5 : vector<8xf32> to vector<8x1xf32>
    %cst_4 = arith.constant 2.560000e+02 : f32
    %7 = vector.broadcast %cst_4 : f32 to vector<8x1xf32>
    %8 = arith.divf %6, %7 : vector<8x1xf32>
    %9 = arith.mulf %4, %4 : vector<8x256xf32>
    %cst_5 = arith.constant dense<0.000000e+00> : vector<8xf32>
    %10 = vector.multi_reduction <add>, %9, %cst_5 [1] : vector<8x256xf32> to vector<8xf32>
    %11 = vector.shape_cast %10 : vector<8xf32> to vector<8x1xf32>
    %cst_6 = arith.constant 2.560000e+02 : f32
    %12 = vector.broadcast %cst_6 : f32 to vector<8x1xf32>
    %13 = arith.divf %11, %12 : vector<8x1xf32>
    %14 = arith.mulf %8, %8 : vector<8x1xf32>
    %15 = arith.subf %13, %14 : vector<8x1xf32>
    %cst_7 = arith.constant 0.000000e+00 : f32
    %16 = vector.broadcast %cst_7 : f32 to vector<8x1xf32>
    %17 = arith.maximumf %15, %16 : vector<8x1xf32>
    %cst_8 = arith.constant 9.99999974E-6 : f32
    %18 = vector.broadcast %cst_8 : f32 to vector<8x1xf32>
    %19 = arith.addf %17, %18 : vector<8x1xf32>
    %20 = math.rsqrt %19 : vector<8x1xf32>
    %21 = vector.extract_strided_slice %0 {offsets = [0, 256], sizes = [8, 256], strides = [1, 1]} : vector<8x1024xf32> to vector<8x256xf32>
    %cst_9 = arith.constant dense<0.000000e+00> : vector<8xf32>
    %22 = vector.multi_reduction <add>, %21, %cst_9 [1] : vector<8x256xf32> to vector<8xf32>
    %23 = vector.shape_cast %22 : vector<8xf32> to vector<8x1xf32>
    %cst_10 = arith.constant 2.560000e+02 : f32
    %24 = vector.broadcast %cst_10 : f32 to vector<8x1xf32>
    %25 = arith.divf %23, %24 : vector<8x1xf32>
    %26 = arith.mulf %21, %21 : vector<8x256xf32>
    %cst_11 = arith.constant dense<0.000000e+00> : vector<8xf32>
    %27 = vector.multi_reduction <add>, %26, %cst_11 [1] : vector<8x256xf32> to vector<8xf32>
    %28 = vector.shape_cast %27 : vector<8xf32> to vector<8x1xf32>
    %cst_12 = arith.constant 2.560000e+02 : f32
    %29 = vector.broadcast %cst_12 : f32 to vector<8x1xf32>
    %30 = arith.divf %28, %29 : vector<8x1xf32>
    %31 = arith.mulf %25, %25 : vector<8x1xf32>
    %32 = arith.subf %30, %31 : vector<8x1xf32>
    %cst_13 = arith.constant 0.000000e+00 : f32
    %33 = vector.broadcast %cst_13 : f32 to vector<8x1xf32>
    %34 = arith.maximumf %32, %33 : vector<8x1xf32>
    %cst_14 = arith.constant 9.99999974E-6 : f32
    %35 = vector.broadcast %cst_14 : f32 to vector<8x1xf32>
    %36 = arith.addf %34, %35 : vector<8x1xf32>
    %37 = math.rsqrt %36 : vector<8x1xf32>
    %38 = vector.extract_strided_slice %0 {offsets = [0, 512], sizes = [8, 256], strides = [1, 1]} : vector<8x1024xf32> to vector<8x256xf32>
    %cst_15 = arith.constant dense<0.000000e+00> : vector<8xf32>
    %39 = vector.multi_reduction <add>, %38, %cst_15 [1] : vector<8x256xf32> to vector<8xf32>
    %40 = vector.shape_cast %39 : vector<8xf32> to vector<8x1xf32>
    %cst_16 = arith.constant 2.560000e+02 : f32
    %41 = vector.broadcast %cst_16 : f32 to vector<8x1xf32>
    %42 = arith.divf %40, %41 : vector<8x1xf32>
    %43 = arith.mulf %38, %38 : vector<8x256xf32>
    %cst_17 = arith.constant dense<0.000000e+00> : vector<8xf32>
    %44 = vector.multi_reduction <add>, %43, %cst_17 [1] : vector<8x256xf32> to vector<8xf32>
    %45 = vector.shape_cast %44 : vector<8xf32> to vector<8x1xf32>
    %cst_18 = arith.constant 2.560000e+02 : f32
    %46 = vector.broadcast %cst_18 : f32 to vector<8x1xf32>
    %47 = arith.divf %45, %46 : vector<8x1xf32>
    %48 = arith.mulf %42, %42 : vector<8x1xf32>
    %49 = arith.subf %47, %48 : vector<8x1xf32>
    %cst_19 = arith.constant 0.000000e+00 : f32
    %50 = vector.broadcast %cst_19 : f32 to vector<8x1xf32>
    %51 = arith.maximumf %49, %50 : vector<8x1xf32>
    %cst_20 = arith.constant 9.99999974E-6 : f32
    %52 = vector.broadcast %cst_20 : f32 to vector<8x1xf32>
    %53 = arith.addf %51, %52 : vector<8x1xf32>
    %54 = math.rsqrt %53 : vector<8x1xf32>
    %55 = vector.extract_strided_slice %0 {offsets = [0, 768], sizes = [8, 256], strides = [1, 1]} : vector<8x1024xf32> to vector<8x256xf32>
    %cst_21 = arith.constant dense<0.000000e+00> : vector<8xf32>
    %56 = vector.multi_reduction <add>, %55, %cst_21 [1] : vector<8x256xf32> to vector<8xf32>
    %57 = vector.shape_cast %56 : vector<8xf32> to vector<8x1xf32>
    %cst_22 = arith.constant 2.560000e+02 : f32
    %58 = vector.broadcast %cst_22 : f32 to vector<8x1xf32>
    %59 = arith.divf %57, %58 : vector<8x1xf32>
    %60 = arith.mulf %55, %55 : vector<8x256xf32>
    %cst_23 = arith.constant dense<0.000000e+00> : vector<8xf32>
    %61 = vector.multi_reduction <add>, %60, %cst_23 [1] : vector<8x256xf32> to vector<8xf32>
    %62 = vector.shape_cast %61 : vector<8xf32> to vector<8x1xf32>
    %cst_24 = arith.constant 2.560000e+02 : f32
    %63 = vector.broadcast %cst_24 : f32 to vector<8x1xf32>
    %64 = arith.divf %62, %63 : vector<8x1xf32>
    %65 = arith.mulf %59, %59 : vector<8x1xf32>
    %66 = arith.subf %64, %65 : vector<8x1xf32>
    %cst_25 = arith.constant 0.000000e+00 : f32
    %67 = vector.broadcast %cst_25 : f32 to vector<8x1xf32>
    %68 = arith.maximumf %66, %67 : vector<8x1xf32>
    %cst_26 = arith.constant 9.99999974E-6 : f32
    %69 = vector.broadcast %cst_26 : f32 to vector<8x1xf32>
    %70 = arith.addf %68, %69 : vector<8x1xf32>
    %71 = math.rsqrt %70 : vector<8x1xf32>
    %72 = tpu.iota {dimensions = array<i32: 1>} : vector<8x128xi32>
    %cst_27 = arith.constant 0.000000e+00 : f32
    %73 = vector.broadcast %cst_27 : f32 to vector<8x128xf32>
    %cst_28 = arith.constant 0.000000e+00 : f32
    %74 = vector.broadcast %cst_28 : f32 to vector<8x128xf32>
    %c0_i32 = arith.constant 0 : i32
    %75 = vector.broadcast %c0_i32 : i32 to vector<8x128xi32>
    %76 = arith.cmpi sge, %72, %75 : vector<8x128xi32>
    %c32_i32 = arith.constant 32 : i32
    %77 = vector.broadcast %c32_i32 : i32 to vector<8x128xi32>
    %78 = arith.cmpi slt, %72, %77 : vector<8x128xi32>
    %79 = arith.andi %76, %78 : vector<8x128xi1>
    %80 = vector.shape_cast %8 : vector<8x1xf32> to vector<8x1xf32>
    %81 = vector.broadcast %80 : vector<8x1xf32> to vector<8x128xf32>
    %82 = arith.select %79, %81, %73 : vector<8x128xi1>, vector<8x128xf32>
    %83 = vector.shape_cast %20 : vector<8x1xf32> to vector<8x1xf32>
    %84 = vector.broadcast %83 : vector<8x1xf32> to vector<8x128xf32>
    %85 = arith.select %79, %84, %74 : vector<8x128xi1>, vector<8x128xf32>
    %c32_i32_29 = arith.constant 32 : i32
    %86 = vector.broadcast %c32_i32_29 : i32 to vector<8x128xi32>
    %87 = arith.cmpi sge, %72, %86 : vector<8x128xi32>
    %c64_i32 = arith.constant 64 : i32
    %88 = vector.broadcast %c64_i32 : i32 to vector<8x128xi32>
    %89 = arith.cmpi slt, %72, %88 : vector<8x128xi32>
    %90 = arith.andi %87, %89 : vector<8x128xi1>
    %91 = vector.shape_cast %25 : vector<8x1xf32> to vector<8x1xf32>
    %92 = vector.broadcast %91 : vector<8x1xf32> to vector<8x128xf32>
    %93 = arith.select %90, %92, %82 : vector<8x128xi1>, vector<8x128xf32>
    %94 = vector.shape_cast %37 : vector<8x1xf32> to vector<8x1xf32>
    %95 = vector.broadcast %94 : vector<8x1xf32> to vector<8x128xf32>
    %96 = arith.select %90, %95, %85 : vector<8x128xi1>, vector<8x128xf32>
    %c64_i32_30 = arith.constant 64 : i32
    %97 = vector.broadcast %c64_i32_30 : i32 to vector<8x128xi32>
    %98 = arith.cmpi sge, %72, %97 : vector<8x128xi32>
    %c96_i32 = arith.constant 96 : i32
    %99 = vector.broadcast %c96_i32 : i32 to vector<8x128xi32>
    %100 = arith.cmpi slt, %72, %99 : vector<8x128xi32>
    %101 = arith.andi %98, %100 : vector<8x128xi1>
    %102 = vector.shape_cast %42 : vector<8x1xf32> to vector<8x1xf32>
    %103 = vector.broadcast %102 : vector<8x1xf32> to vector<8x128xf32>
    %104 = arith.select %101, %103, %93 : vector<8x128xi1>, vector<8x128xf32>
    %105 = vector.shape_cast %54 : vector<8x1xf32> to vector<8x1xf32>
    %106 = vector.broadcast %105 : vector<8x1xf32> to vector<8x128xf32>
    %107 = arith.select %101, %106, %96 : vector<8x128xi1>, vector<8x128xf32>
    %c96_i32_31 = arith.constant 96 : i32
    %108 = vector.broadcast %c96_i32_31 : i32 to vector<8x128xi32>
    %109 = arith.cmpi sge, %72, %108 : vector<8x128xi32>
    %c128_i32 = arith.constant 128 : i32
    %110 = vector.broadcast %c128_i32 : i32 to vector<8x128xi32>
    %111 = arith.cmpi slt, %72, %110 : vector<8x128xi32>
    %112 = arith.andi %109, %111 : vector<8x128xi1>
    %113 = vector.shape_cast %59 : vector<8x1xf32> to vector<8x1xf32>
    %114 = vector.broadcast %113 : vector<8x1xf32> to vector<8x128xf32>
    %115 = arith.select %112, %114, %104 : vector<8x128xi1>, vector<8x128xf32>
    %116 = vector.shape_cast %71 : vector<8x1xf32> to vector<8x1xf32>
    %117 = vector.broadcast %116 : vector<8x1xf32> to vector<8x128xf32>
    %118 = arith.select %112, %117, %107 : vector<8x128xi1>, vector<8x128xf32>
    %c0_32 = arith.constant 0 : index
    %c0_33 = arith.constant 0 : index
    %119 = vector.load %arg3[%c0_32, %c0_33] : memref<1x128xf32, #tpu.memory_space<vmem>>, vector<1x128xf32>
    %120 = vector.broadcast %119 : vector<1x128xf32> to vector<8x128xf32>
    %121 = arith.mulf %115, %120 : vector<8x128xf32>
    %122 = arith.subf %3, %121 : vector<8x128xf32>
    %123 = arith.mulf %118, %122 : vector<8x128xf32>
    %c0_34 = arith.constant 0 : index
    %c0_35 = arith.constant 0 : index
    %124 = vector.load %arg4[%c0_34, %c0_35] : memref<1x128xf32, #tpu.memory_space<vmem>>, vector<1x128xf32>
    %125 = vector.broadcast %124 : vector<1x128xf32> to vector<8x128xf32>
    %126 = arith.addf %123, %125 : vector<8x128xf32>
    %c0_36 = arith.constant 0 : index
    %c0_37 = arith.constant 0 : index
    %127 = vector.load %arg5[%c0_36, %c0_37] : memref<8x128xf32, #tpu.memory_space<vmem>>, vector<8x128xf32>
    tpu.vector_store %arg5[%c0_36, %c0_37], %126 {strides = array<i32>} : memref<8x128xf32, #tpu.memory_space<vmem>>, vector<8x128xf32>,
    return
  }
  func.func @transform_0(%arg0: i32) -> (i32, i32) {
    %c0_i32 = arith.constant 0 : i32
    %c0_i32_0 = arith.constant 0 : i32
    return %arg0, %c0_i32 : i32, i32
  }
  func.func @transform_1(%arg0: i32) -> (i32, i32) {
    %c0_i32 = arith.constant 0 : i32
    %c0_i32_0 = arith.constant 0 : i32
    %c0_i32_1 = arith.constant 0 : i32
    return %c0_i32, %c0_i32_0 : i32, i32
  }
  func.func @transform_2(%arg0: i32) -> (i32, i32) {
    %c0_i32 = arith.constant 0 : i32
    %c0_i32_0 = arith.constant 0 : i32
    %c0_i32_1 = arith.constant 0 : i32
    return %c0_i32, %c0_i32_0 : i32, i32
  }
  func.func @transform_3(%arg0: i32) -> (i32, i32) {
    %c0_i32 = arith.constant 0 : i32
    %c0_i32_0 = arith.constant 0 : i32
    %c0_i32_1 = arith.constant 0 : i32
    return %c0_i32, %c0_i32_0 : i32, i32
  }
  func.func @transform_4(%arg0: i32) -> (i32, i32) {
    %c0_i32 = arith.constant 0 : i32
    %c0_i32_0 = arith.constant 0 : i32
    return %arg0, %c0_i32 : i32, i32
  }
}

</mosaic_0001>

<bundles_post_ra>
// kernel: tpu_custom_call.1
= control target key start
LH: loop header
LB: loop body
LE: loop exit
PB: predicated region body
PF: predicated region fallthrough
CT: control target
= control target key end

     0   :  { %9 = vsyncpa [#allocation3], 0  ;;  %s1267_s0 = inlined_call_operand.hbm [shape: f32[8,1024], index: 0, kind: input, shape index: {}]   ;;  %s1268_s1 = inlined_call_operand.hbm [shape: bf16[1024,128], index: 1, kind: input, shape index: {}]   ;;  %s1269_s2 = inlined_call_operand.vmem [shape: f32[1,128], index: 2, kind: input, shape index: {}]   ;;  %s1270_s3 = inlined_call_operand.vmem [shape: f32[1,128], index: 3, kind: input, shape index: {}]   ;;  %s1271_s4 = inlined_call_operand.hbm [shape: f32[8,128], index: 4, kind: output, shape index: {}]  }
   0x1   :  { %10 = vsyncpa [#allocation6], 0 }
   0x2   :  { %11 = vsyncpa [#allocation4], 0  ;;  %s1154_s15 = smov [#allocation2]   ;;  %s1155_s17 = smov [#allocation5]  }
   0x3   :  { %s18_s16 = sshll.u32 %s1154_s15, 4  ;;  %s27_s18 = sshll.u32 %s1155_s17, 4  ;;  %s19_s16 = int_to_ptr.vmem [resolvable:$true] %s18_s16  ;;  %s1184_s18 = int_to_ptr.vmem [resolvable:$true] %s27_s18 }
   0x4   :  { %s1082_s21 = scalar_lea.hbm %s1267_s0, 1024 }
   0x5   :  { %p1083_p0 = scmp.ne.s32.totalorder %s1267_s0, %s1082_s21  ;;  %p1086_p1 = scmp.lt.u32.totalorder %s1082_s21, %s1267_s0 }
   0x7   :  { %p1088_p2 = pnand %p1086_p1, %p1083_p0 }
   0x9   :  { %1091 = shalt.err (!%p1088_p2)
}
   0xa   :  { %s1092_s26 = scalar_lea.vmem %s19_s16, 1024  ;;  %p1097_p4 = scmp.lt.s32.totalorder %s19_s16, %s19_s16 }
   0xb   :  { %p1093_p3 = scmp.ne.s32.totalorder %s19_s16, %s1092_s26  ;;  %p1098_p5 = scmp.lt.s32.totalorder %s1092_s26, %s1092_s26 }
   0xd   :  { %p1099_p6 = por %p1098_p5, %p1097_p4 }
   0xf   :  { %p1100_p7 = pnand %p1099_p6, %p1093_p3 }
  0x11   :  { %1103 = shalt.err (!%p1100_p7)
}
  0x12   :  { %21 = dma.hbm_to_vmem [thread:$0]  %s1267_s0, 1024, %s19_s16, [#allocation3]  }
  0x13   :  { %s1104_s5 = scalar_lea.hbm %s1268_s1, 8192 }
  0x14   :  { %p1105_p8 = scmp.ne.s32.totalorder %s1268_s1, %s1104_s5  ;;  %p1108_p9 = scmp.lt.u32.totalorder %s1104_s5, %s1268_s1 }
  0x16   :  { %p1110_p10 = pnand %p1108_p9, %p1105_p8 }
  0x18   :  { %1113 = shalt.err (!%p1110_p10)
}
  0x19   :  { %s1114_s10 = scalar_lea.vmem %s1184_s18, 8192  ;;  %p1119_p12 = scmp.lt.s32.totalorder %s1184_s18, %s1184_s18 }
  0x1a   :  { %p1115_p11 = scmp.ne.s32.totalorder %s1184_s18, %s1114_s10  ;;  %p1120_p13 = scmp.lt.s32.totalorder %s1114_s10, %s1114_s10 }
  0x1c   :  { %p1121_p0 = por %p1120_p13, %p1119_p12 }
  0x1e   :  { %p1122_p1 = pnand %p1121_p0, %p1115_p11 }
  0x20   :  { %1125 = shalt.err (!%p1122_p1)
}
  0x21   :  { %s1156_s0 = smov 64   ;;  %s1157_s11 = smov 4  }
  0x22   :  { %33 = dma.hbm_to_vmem [thread:$0]  %s1268_s1, 8192, %s1184_s18, [#allocation6], %s1156_s0, %s1156_s0, %s1157_s11  }
  0x23   :  { %1148 = dma.done.wait [#allocation3], 1024  }
  0x24   :  { %1149 = vsyncadd [#allocation3], 4294966272 }
  0x25   :  { %1150 = dma.done.wait [#allocation6], 8192  }
  0x26   :  { %1151 = vsyncadd [#allocation6], 4294959104  ;;  %v1010_v0 = vld [vmem:[#allocation5 + $0x40] sm:$0xff]   ;;  %v1014_v4 = vld [vmem:[#allocation5 + $0x48] sm:$0xff]   ;;  %s1158_s16 = smov [#allocation7]  }
  0x27   :  { %v1011_v1 = vld [vmem:[#allocation5 + $0xc0] sm:$0xff]   ;;  %917 = vmatprep.subr.bf16.mxu0 %v1010_v0  ;;  %v1015_v5 = vld [vmem:[#allocation5 + $0xc8] sm:$0xff]   ;;  %v1018_v8 = vld [vmem:[#allocation5 + $0x50] sm:$0xff]   ;;  %s841_s17 = sshll.u32 %s1158_s16, 4  ;;  %s842_s17 = int_to_ptr.vmem [resolvable:$true] %s841_s17 }
  0x28   :  { %v1012_v2 = vld [vmem:[#allocation5] sm:$0xff]   ;;  %939 = vmatprep.subr.bf16.mxu1 %v1011_v1  ;;  %v1016_v6 = vld [vmem:[#allocation5 + $0x8] sm:$0xff]   ;;  %v1019_v9 = vld [vmem:[#allocation5 + $0xd0] sm:$0xff]   ;;  %s1126_s18 = scalar_lea.vmem %s842_s17, 128  ;;  %p1131_p3 = scmp.lt.s32.totalorder %s842_s17, %s842_s17 }
  0x29   :  { %v1013_v3 = vld [vmem:[#allocation5 + $0x80] sm:$0xff]   ;;  %918 = vmatpush3.bf16.msra.mxu0 %v1012_v2  ;;  %v1017_v7 = vld [vmem:[#allocation5 + $0x88] sm:$0xff]   ;;  %v1020_v10 = vld [vmem:[#allocation5 + $0x10] sm:$0xff]   ;;  %p1127_p2 = scmp.ne.s32.totalorder %s842_s17, %s1126_s18  ;;  %p1132_p4 = scmp.lt.s32.totalorder %s1126_s18, %s1126_s18 }
  0x2a   :  { %940 = vmatpush3.bf16.msra.mxu1 %v1013_v3  ;;  %919 = vmatprep.subr.bf16.mxu0 %v1014_v4  ;;  %v1021_v11 = vld [vmem:[#allocation5 + $0x90] sm:$0xff]   ;;  %v1022_v12 = vld [vmem:[#allocation5 + $0x58] sm:$0xff]   ;;  %v1026_v16 = vld [vmem:[#allocation5 + $0x60] sm:$0xff]  }
  0x2b   :  { %941 = vmatprep.subr.bf16.mxu1 %v1015_v5  ;;  %v1023_v13 = vld [vmem:[#allocation5 + $0xd8] sm:$0xff]   ;;  %v1027_v17 = vld [vmem:[#allocation5 + $0xe0] sm:$0xff]   ;;  %v1030_v20 = vld [vmem:[#allocation5 + $0x68] sm:$0xff]   ;;  %p1133_p5 = por %p1132_p4, %p1131_p3 }
  0x2c   :  { %v1024_v14 = vld [vmem:[#allocation5 + $0x18] sm:$0xff]   ;;  %v1028_v18 = vld [vmem:[#allocation5 + $0x20] sm:$0xff]   ;;  %v1031_v21 = vld [vmem:[#allocation5 + $0xe8] sm:$0xff]  }
  0x2d   :  { %920 = vmatpush3.bf16.msra.mxu0 %v1016_v6  ;;  %v1025_v15 = vld [vmem:[#allocation5 + $0x98] sm:$0xff]   ;;  %v1029_v19 = vld [vmem:[#allocation5 + $0xa0] sm:$0xff]   ;;  %v1032_v22 = vld [vmem:[#allocation5 + $0x28] sm:$0xff]   ;;  %p1134_p6 = pnand %p1133_p5, %p1127_p2 }
  0x2e   :  { %942 = vmatpush3.bf16.msra.mxu1 %v1017_v7  ;;  %921 = vmatprep.subr.bf16.mxu0 %v1018_v8  ;;  %v1033_v23 = vld [vmem:[#allocation5 + $0xa8] sm:$0xff]   ;;  %v1034_v24 = vld [vmem:[#allocation5 + $0x70] sm:$0xff]   ;;  %v1038_v28 = vld [vmem:[#allocation5 + $0x78] sm:$0xff]  }
  0x2f   :  { %943 = vmatprep.subr.bf16.mxu1 %v1019_v9  ;;  %v1035_v25 = vld [vmem:[#allocation5 + $0xf0] sm:$0xff]   ;;  %v1039_v29 = vld [vmem:[#allocation5 + $0xf8] sm:$0xff]   ;;  %v1215_v32 = vld [vmem:[#allocation2 + $0x8] sm:$0xff] }
  0x30   :  { %v1036_v26 = vld [vmem:[#allocation5 + $0x30] sm:$0xff]   ;;  %v1040_v30 = vld [vmem:[#allocation5 + $0x38] sm:$0xff]   ;;  %v1217_v34 = vld [vmem:[#allocation2] sm:$0xff]  ;;  %v54_v35 = vpack.c.bf16 %v1215_v32, %v1215_v32 }
  0x31   :  { %922 = vmatpush3.bf16.msra.mxu0 %v1020_v10  ;;  %v1037_v27 = vld [vmem:[#allocation5 + $0xb0] sm:$0xff]   ;;  %v1041_v31 = vld [vmem:[#allocation5 + $0xb8] sm:$0xff]   ;;  %v53_v37 = vpack.c.bf16 %v1217_v34, %v1217_v34  ;;  %v1042_v40 = vld [vmem:[#allocation5 + $0x140] sm:$0xff]   ;;  %v733_v41 = vadd.f32 %v1215_v32, %v1217_v34 }
  0x32   :  { %944 = vmatpush3.bf16.msra.mxu1 %v1021_v11  ;;  %923 = vmatprep.subr.bf16.mxu0 %v1022_v12  ;;  %v48_v33 = vld [vmem:[#allocation2 + $0x18] sm:$0xff]  ;;  %v47_v38 = vld [vmem:[#allocation2 + $0x10] sm:$0xff]  ;;  %v1043_v42 = vld [vmem:[#allocation5 + $0x1c0] sm:$0xff]  }
  0x33   :  { %945 = vmatprep.subr.bf16.mxu1 %v1023_v13  ;;  %v56_v36 = vpack.c.bf16 %v48_v33, %v48_v33  ;;  %v55_v39 = vpack.c.bf16 %v47_v38, %v47_v38  ;;  %605 = vmatprep.mubr.bf16.mxu0 %v54_v35  ;;  %v1044_v43 = vld [vmem:[#allocation5 + $0x100] sm:$0xff]   ;;  %v1046_v45 = vld [vmem:[#allocation5 + $0x148] sm:$0xff]   ;;  %v749_v46 = vadd.f32 %v48_v33, %v47_v38  ;;  %v1050_v52 = vld [vmem:[#allocation5 + $0x150] sm:$0xff]  }
  0x34   :  { %v1045_v44 = vld [vmem:[#allocation5 + $0x180] sm:$0xff]   ;;  %734 = vadd.xlane.f32.xlu0 %v733_v41  ;;  %v753_v47 = vmul.f32 %v47_v38, %v47_v38  ;;  %v754_v48 = vmul.f32 %v48_v33, %v48_v33  ;;  %v1047_v49 = vld [vmem:[#allocation5 + $0x1c8] sm:$0xff]   ;;  %v1051_v54 = vld [vmem:[#allocation5 + $0x1d0] sm:$0xff]  }
  0x35   :  { %924 = vmatpush3.bf16.msra.mxu0 %v1024_v14  ;;  %645 = vmatprep.mubr.bf16.mxu1 %v56_v36  ;;  %v1048_v50 = vld [vmem:[#allocation5 + $0x108] sm:$0xff]   ;;  %v1052_v55 = vld [vmem:[#allocation5 + $0x110] sm:$0xff]   ;;  %v1054_v57 = vld [vmem:[#allocation5 + $0x158] sm:$0xff]  }
  0x36   :  { %946 = vmatpush3.bf16.msra.mxu1 %v1025_v15  ;;  %925 = vmatprep.subr.bf16.mxu0 %v1026_v16  ;;  %v1049_v51 = vld [vmem:[#allocation5 + $0x188] sm:$0xff]   ;;  %v755_v53 = vadd.f32 %v754_v48, %v753_v47  ;;  %v1053_v56 = vld [vmem:[#allocation5 + $0x190] sm:$0xff]   ;;  %v1055_v58 = vld [vmem:[#allocation5 + $0x1d8] sm:$0xff]  }
  0x37   :  { %947 = vmatprep.subr.bf16.mxu1 %v1027_v17  ;;  %v1056_v59 = vld [vmem:[#allocation5 + $0x118] sm:$0xff]   ;;  %v1058_v61 = vld [vmem:[#allocation5 + $0x160] sm:$0xff]   ;;  %v1062_v1 = vld [vmem:[#allocation5 + $0x168] sm:$0xff]  }
  0x38   :  { %750 = vadd.xlane.f32.xlu0 %v749_v46  ;;  %v1057_v60 = vld [vmem:[#allocation5 + $0x198] sm:$0xff]   ;;  %v1059_v62 = vld [vmem:[#allocation5 + $0x1e0] sm:$0xff]   ;;  %v1063_v2 = vld [vmem:[#allocation5 + $0x1e8] sm:$0xff]  }
  0x39   :  { %926 = vmatpush3.bf16.msra.mxu0 %v1028_v18  ;;  %v1060_v63 = vld [vmem:[#allocation5 + $0x120] sm:$0xff]   ;;  %v1064_v3 = vld [vmem:[#allocation5 + $0x128] sm:$0xff]   ;;  %v1066_v5 = vld [vmem:[#allocation5 + $0x170] sm:$0xff]  }
  0x3a   :  { %948 = vmatpush3.bf16.msra.mxu1 %v1029_v19  ;;  %927 = vmatprep.subr.bf16.mxu0 %v1030_v20  ;;  %v1061_v0 = vld [vmem:[#allocation5 + $0x1a0] sm:$0xff]   ;;  %v1065_v4 = vld [vmem:[#allocation5 + $0x1a8] sm:$0xff]   ;;  %v1067_v6 = vld [vmem:[#allocation5 + $0x1f0] sm:$0xff]  }
  0x3b   :  { %949 = vmatprep.subr.bf16.mxu1 %v1031_v21  ;;  %v1068_v7 = vld [vmem:[#allocation5 + $0x130] sm:$0xff]   ;;  %v1070_v9 = vld [vmem:[#allocation5 + $0x178] sm:$0xff]   ;;  %v50_v13 = vld [vmem:[#allocation2 + $0x28] sm:$0xff] }
  0x3c   :  { %756 = vadd.xlane.f32.xlu0 %v755_v53  ;;  %v1069_v8 = vld [vmem:[#allocation5 + $0x1b0] sm:$0xff]   ;;  %v1071_v10 = vld [vmem:[#allocation5 + $0x1f8] sm:$0xff]   ;;  %v58_v15 = vpack.c.bf16 %v50_v13, %v50_v13  ;;  %v49_v17 = vld [vmem:[#allocation2 + $0x20] sm:$0xff]  ;;  %v769_v19 = vmul.f32 %v50_v13, %v50_v13 }
  0x3d   :  { %928 = vmatpush3.bf16.msra.mxu0 %v1032_v22  ;;  %v1072_v11 = vld [vmem:[#allocation5 + $0x138] sm:$0xff]   ;;  %v51_v18 = vld [vmem:[#allocation2 + $0x30] sm:$0xff]  ;;  %v57_v20 = vpack.c.bf16 %v49_v17, %v49_v17  ;;  %v764_v22 = vadd.f32 %v50_v13, %v49_v17 }
  0x3e   :  { %950 = vmatpush3.bf16.msra.mxu1 %v1033_v23  ;;  %929 = vmatprep.subr.bf16.mxu0 %v1034_v24  ;;  %v1073_v12 = vld [vmem:[#allocation5 + $0x1b8] sm:$0xff]   ;;  %v59_v21 = vpack.c.bf16 %v51_v18, %v51_v18  ;;  %v768_v23 = vmul.f32 %v49_v17, %v49_v17 }
  0x3f   :  { %951 = vmatprep.subr.bf16.mxu1 %v1035_v25  ;;  %v52_v14 = vld [vmem:[#allocation2 + $0x38] sm:$0xff]  ;;  %765 = vadd.xlane.f32.xlu1 %v764_v22  ;;  %v738_v25 = vmul.f32 %v1217_v34, %v1217_v34 }
  0x40   :  { %v60_v16 = vpack.c.bf16 %v52_v14, %v52_v14  ;;  %v779_v24 = vadd.f32 %v52_v14, %v51_v18 }
  0x41   :  { %930 = vmatpush3.bf16.msra.mxu0 %v1036_v26  ;;  %v739_v26 = vmul.f32 %v1215_v32, %v1215_v32 }
  0x42   :  { %952 = vmatpush3.bf16.msra.mxu1 %v1037_v27  ;;  %931 = vmatprep.subr.bf16.mxu0 %v1038_v28  ;;  %v770_v27 = vadd.f32 %v769_v19, %v768_v23 }
  0x43   :  { %953 = vmatprep.subr.bf16.mxu1 %v1039_v29  ;;  %780 = vadd.xlane.f32.xlu1 %v779_v24  ;;  %v740_v28 = vadd.f32 %v739_v26, %v738_v25  ;;  %v783_v29 = vmul.f32 %v51_v18, %v51_v18 }
  0x44   :  { %771 = vadd.xlane.f32.xlu0 %v770_v27 }
  0x45   :  { %932 = vmatpush3.bf16.msra.mxu0 %v1040_v30  ;;  %v784_v30 = vmul.f32 %v52_v14, %v52_v14 }
  0x46   :  { %954 = vmatpush3.bf16.msra.mxu1 %v1041_v31  ;;  %961 = vmatprep.subr.bf16.mxu0 %v1042_v40 }
  0x47   :  { %983 = vmatprep.subr.bf16.mxu1 %v1043_v42  ;;  %741 = vadd.xlane.f32.xlu1 %v740_v28  ;;  %v785_v31 = vadd.f32 %v784_v30, %v783_v29  ;;  %v915_v28 = vld [vmem:[%s1269_s2] ss:$0 sm:$0xff] }
  0x48   :  { %606 = vmatmul.mubr.bf16.vlgmr.msra.gmra.mrb[0].mxu0 %v53_v37 }
  0x49   :  { %646 = vmatmul.mubr.bf16.vlgmr.msra.gmra.mrb[0].mxu1 %v55_v39  ;;  %962 = vmatpush3.bf16.msra.mxu0 %v1044_v43 }
  0x4a   :  { %984 = vmatpush3.bf16.msra.mxu1 %v1045_v44  ;;  %963 = vmatprep.subr.bf16.mxu0 %v1046_v45 }
  0x4b   :  { %985 = vmatprep.subr.bf16.mxu1 %v1047_v49  ;;  %685 = vmatprep.mubr.bf16.mxu0 %v58_v15 }
  0x4c   :  { %725 = vmatprep.mubr.bf16.mxu1 %v60_v16  ;;  %786 = vadd.xlane.f32.xlu1 %v785_v31 }
  0x4d   :  { %964 = vmatpush3.bf16.msra.mxu0 %v1048_v50 }
  0x4e   :  { %986 = vmatpush3.bf16.msra.mxu1 %v1049_v51  ;;  %965 = vmatprep.subr.bf16.mxu0 %v1050_v52 }
  0x4f   :  { %987 = vmatprep.subr.bf16.mxu1 %v1051_v54 }
  0x51   :  { %966 = vmatpush3.bf16.msra.mxu0 %v1052_v55 }
  0x52   :  { %988 = vmatpush3.bf16.msra.mxu1 %v1053_v56  ;;  %967 = vmatprep.subr.bf16.mxu0 %v1054_v57 }
  0x53   :  { %989 = vmatprep.subr.bf16.mxu1 %v1055_v58 }
  0x55   :  { %968 = vmatpush3.bf16.msra.mxu0 %v1056_v59 }
  0x56   :  { %990 = vmatpush3.bf16.msra.mxu1 %v1057_v60  ;;  %969 = vmatprep.subr.bf16.mxu0 %v1058_v61 }
  0x57   :  { %991 = vmatprep.subr.bf16.mxu1 %v1059_v62 }
  0x59   :  { %970 = vmatpush3.bf16.msra.mxu0 %v1060_v63 }
  0x5a   :  { %992 = vmatpush3.bf16.msra.mxu1 %v1061_v0  ;;  %971 = vmatprep.subr.bf16.mxu0 %v1062_v1 }
  0x5b   :  { %993 = vmatprep.subr.bf16.mxu1 %v1063_v2 }
  0x5d   :  { %972 = vmatpush3.bf16.msra.mxu0 %v1064_v3 }
  0x5e   :  { %994 = vmatpush3.bf16.msra.mxu1 %v1065_v4  ;;  %973 = vmatprep.subr.bf16.mxu0 %v1066_v5  ;;  %v794_v4 = vlaneseq }
  0x5f   :  { %995 = vmatprep.subr.bf16.mxu1 %v1067_v6 }
  0x61   :  { %974 = vmatpush3.bf16.msra.mxu0 %v1068_v7 }
  0x62   :  { %996 = vmatpush3.bf16.msra.mxu1 %v1069_v8  ;;  %975 = vmatprep.subr.bf16.mxu0 %v1070_v9  ;;  %v795_v9 = vand.u32 127, %v794_v4 }
  0x63   :  { %997 = vmatprep.subr.bf16.mxu1 %v1071_v10 }
  0x64   :  { %vm797_vm0 = vcmp.lt.s32.totalorder %v795_v9, 32  ;;  %vm801_vm1 = vcmp.ge.s32.totalorder %v795_v9, 32  ;;  %vm802_vm2 = vcmp.lt.s32.totalorder %v795_v9, 64  ;;  %vm806_vm4 = vcmp.ge.s32.totalorder %v795_v9, 64 }
  0x65   :  { %976 = vmatpush3.bf16.msra.mxu0 %v1072_v11  ;;  %vm1230_vm3 = vmand %vm801_vm1, %vm802_vm2  ;;  %vm807_vm5 = vcmp.lt.s32.totalorder %v795_v9, 96  ;;  %vm811_vm7 = vcmp.ge.s32.totalorder %v795_v9, 96 }
  0x66   :  { %998 = vmatpush3.bf16.msra.mxu1 %v1073_v12  ;;  %vm1236_vm6 = vmand %vm806_vm4, %vm807_vm5 }
  0x68   :  { %686 = vmatmul.mubr.bf16.vlgmr.msra.gmra.mrb[4].mxu0 %v57_v20 }
  0x69   :  { %726 = vmatmul.mubr.bf16.vlgmr.msra.gmra.mrb[4].mxu1 %v59_v21 }
  0xc1   :  { %v735_v33 = vpop.xlane.xlu0 %734 }
  0xc2   :  { %v737_v34 = vmul.f32 0.00390625, %v735_v33 }
  0xc4   :  { %v744_v50 = vmul.f32 %v737_v34, %v737_v34  ;;  %v799_v13 = vsel %vm797_vm0, %v737_v34, 0.0 }
  0xc5   :  { %v751_v36 = vpop.xlane.xlu0 %750 }
  0xc6   :  { %v752_v48 = vmul.f32 0.00390625, %v751_v36 }
  0xc8   :  { %v759_v54 = vmul.f32 %v752_v48, %v752_v48  ;;  %v804_v16 = vsel %vm1230_vm3, %v752_v48, %v799_v13 }
  0xc9   :  { %v757_v38 = vpop.xlane.xlu0 %756 }
  0xca   :  { %v758_v55 = vmul.f32 0.00390625, %v757_v38 }
  0xcc   :  { %v766_v35 = vpop.xlane.xlu1 %765  ;;  %v760_v62 = vsub.f32 %v758_v55, %v759_v54 }
  0xcd   :  { %v767_v53 = vmul.f32 0.00390625, %v766_v35 }
  0xce   :  { %v761_v3 = vmax.f32 %v760_v62, 0.0 }
  0xcf   :  { %v774_v59 = vmul.f32 %v767_v53, %v767_v53  ;;  %v809_v19 = vsel %vm1236_vm6, %v767_v53, %v804_v16 }
  0xd0   :  { %v781_v37 = vpop.xlane.xlu1 %780  ;;  %v762_v8 = vadd.f32 1e-05, %v761_v3 }
  0xd1   :  { %v772_v56 = vpop.xlane.xlu0 %771  ;;  %v782_v58 = vmul.f32 0.00390625, %v781_v37 }
  0xd2   :  { %v773_v60 = vmul.f32 0.00390625, %v772_v56 }
  0xd3   :  { %v789_v0 = vmul.f32 %v782_v58, %v782_v58  ;;  %v814_v29 = vsel %vm811_vm7, %v782_v58, %v809_v19 }
  0xd4   :  { %v742_v39 = vpop.xlane.xlu1 %741  ;;  %v775_v2 = vsub.f32 %v773_v60, %v774_v59 }
  0xd5   :  { %v743_v52 = vmul.f32 0.00390625, %v742_v39  ;;  %v823_v39 = vmul.f32 %v915_v28, %v814_v29 }
  0xd6   :  { %v776_v7 = vmax.f32 %v775_v2, 0.0 }
  0xd7   :  { %v745_v57 = vsub.f32 %v743_v52, %v744_v50 }
  0xd8   :  { %v777_v11 = vadd.f32 1e-05, %v776_v7 }
  0xd9   :  { %v787_v61 = vpop.xlane.xlu1 %786  ;;  %v746_v63 = vmax.f32 %v745_v57, 0.0 }
  0xda   :  { %v788_v1 = vmul.f32 0.00390625, %v787_v61 }
  0xdb   :  { %v747_v5 = vadd.f32 1e-05, %v746_v63 }
  0xdc   :  { %v790_v6 = vsub.f32 %v788_v1, %v789_v0 }
  0xdd   :  { %1074 = vrsqrt.f32 %v747_v5 }
  0xde   :  { %v791_v10 = vmax.f32 %v790_v6, 0.0  ;;  %1076 = vrsqrt.f32 %v762_v8 }
  0xdf   :  { %1078 = vrsqrt.f32 %v777_v11 }
  0xe0   :  { %v792_v12 = vadd.f32 1e-05, %v791_v10 }
  0xe2   :  { %1080 = vrsqrt.f32 %v792_v12 }
  0xe7   :  { %v1075_v15 = vpop.eup %1074 }
  0xe8   :  { %v1077_v18 = vpop.eup %1076  ;;  %v800_v21 = vsel %vm797_vm0, %v1075_v15, 0.0 }
  0xe9   :  { %v1079_v27 = vpop.eup %1078  ;;  %v805_v35 = vsel %vm1230_vm3, %v1077_v18, %v800_v21 }
  0xec   :  { %v1081_v38 = vpop.eup %1080 }
 0x11b   :  { %v933_v40 = vpop.f32.mrb[0].mxu0 }
 0x11c   :  { %v955_v41 = vpop.f32.mrb[0].mxu1  ;;  %v934_v32 = vpop.f32.mrb[1].mxu0 }
 0x11d   :  { %v956_v42 = vpop.f32.mrb[1].mxu1  ;;  %v935_v43 = vadd.f32 %v934_v32, %v933_v40  ;;  %v936_v45 = vpop.f32.mrb[2].mxu0  ;;  %v810_v40 = vsel %vm1236_vm6, %v1079_v27, %v805_v35 }
 0x11e   :  { %v957_v44 = vadd.f32 %v956_v42, %v955_v41  ;;  %v958_v46 = vpop.f32.mrb[2].mxu1  ;;  %v937_v49 = vpop.f32.mrb[3].mxu0  ;;  %v815_v32 = vsel %vm811_vm7, %v1081_v38, %v810_v40  ;;  %v916_v42 = vld [vmem:[%s1270_s3] ss:$0 sm:$0xff] }
 0x11f   :  { %v959_v47 = vpop.f32.mrb[3].mxu1 }
 0x120   :  { %v648_v51 = vadd.f32 %v957_v44, %v935_v43 }
 0x13b   :  { %v977_v20 = vpop.f32.mrb[4].mxu0 }
 0x13c   :  { %v999_v22 = vpop.f32.mrb[4].mxu1  ;;  %v978_v23 = vpop.f32.mrb[5].mxu0 }
 0x13d   :  { %v979_v24 = vadd.f32 %v978_v23, %v977_v20  ;;  %v1000_v25 = vpop.f32.mrb[5].mxu1  ;;  %v980_v26 = vpop.f32.mrb[6].mxu0 }
 0x13e   :  { %v1001_v30 = vadd.f32 %v1000_v25, %v999_v22  ;;  %v1002_v31 = vpop.f32.mrb[6].mxu1  ;;  %v981_v33 = vpop.f32.mrb[7].mxu0 }
 0x13f   :  { %v688_v36 = vadd.f32 %v979_v24, %v648_v51  ;;  %v1003_v37 = vpop.f32.mrb[7].mxu1 }
 0x141   :  { %v728_v34 = vadd.f32 %v1001_v30, %v688_v36 }
 0x143   :  { %v824_v41 = vsub.f32 %v728_v34, %v823_v39 }
 0x145   :  { %v825_v43 = vmul.f32 %v824_v41, %v815_v32 }
 0x147   :  { %v833_v44 = vadd.f32 %v916_v42, %v825_v43 }
 0x149   :  { %834 = vst [vmem:[#allocation7] sm:$0xff] %v833_v44 }
 0x14a   :  { %1137 = shalt.err (!%p1134_p6)
}
 0x14b   :  { %s1138_s21 = scalar_lea.hbm %s1271_s4, 128 }
 0x14c   :  { %p1139_p7 = scmp.ne.s32.totalorder %s1271_s4, %s1138_s21  ;;  %p1142_p8 = scmp.lt.u32.totalorder %s1138_s21, %s1271_s4 }
 0x14e   :  { %p1144_p9 = pnand %p1142_p8, %p1139_p7 }
 0x150   :  { %1147 = shalt.err (!%p1144_p9)
}
 0x151   :  { %844 = dma.vmem_to_hbm [thread:$0]  %s842_s17, 128, %s1271_s4, [#allocation4]  }
 0x152   :  { %1152 = dma.done.wait [#allocation4], 128  }
 0x153   :  { %1153 = vsyncadd [#allocation4], 4294967168 }
 0x154   :  { %848 = vsyncpa [#allocation3], 1 }
 0x155   :  { %849 = vsyncpa [#allocation6], 1 }
 0x156   :  { %850 = vsyncpa [#allocation4], 1 }

// kernel: tpu_custom_call.1
= control target key start
LH: loop header
LB: loop body
LE: loop exit
PB: predicated region body
PF: predicated region fallthrough
CT: control target
= control target key end

     0   :  { %9 = vsyncpa [#allocation3], 0  ;;  %s1267_s0 = inlined_call_operand.hbm [shape: f32[8,1024], index: 0, kind: input, shape index: {}]   ;;  %s1268_s1 = inlined_call_operand.hbm [shape: bf16[1024,128], index: 1, kind: input, shape index: {}]   ;;  %s1269_s2 = inlined_call_operand.vmem [shape: f32[1,128], index: 2, kind: input, shape index: {}]   ;;  %s1270_s3 = inlined_call_operand.vmem [shape: f32[1,128], index: 3, kind: input, shape index: {}]   ;;  %s1271_s4 = inlined_call_operand.hbm [shape: f32[8,128], index: 4, kind: output, shape index: {}]  }
   0x1   :  { %10 = vsyncpa [#allocation6], 0 }
   0x2   :  { %11 = vsyncpa [#allocation4], 0  ;;  %s1154_s15 = smov [#allocation2]   ;;  %s1155_s17 = smov [#allocation5]  }
   0x3   :  { %s18_s16 = sshll.u32 %s1154_s15, 4  ;;  %s27_s18 = sshll.u32 %s1155_s17, 4  ;;  %s19_s16 = int_to_ptr.vmem [resolvable:$true] %s18_s16  ;;  %s1184_s18 = int_to_ptr.vmem [resolvable:$true] %s27_s18 }
   0x4   :  { %s1082_s21 = scalar_lea.hbm %s1267_s0, 1024 }
   0x5   :  { %p1083_p0 = scmp.ne.s32.totalorder %s1267_s0, %s1082_s21  ;;  %p1086_p1 = scmp.lt.u32.totalorder %s1082_s21, %s1267_s0 }
   0x7   :  { %p1088_p2 = pnand %p1086_p1, %p1083_p0 }
   0x9   :  { %1091 = shalt.err (!%p1088_p2)
}
   0xa   :  { %s1092_s26 = scalar_lea.vmem %s19_s16, 1024  ;;  %p1097_p4 = scmp.lt.s32.totalorder %s19_s16, %s19_s16 }
   0xb   :  { %p1093_p3 = scmp.ne.s32.totalorder %s19_s16, %s1092_s26  ;;  %p1098_p5 = scmp.lt.s32.totalorder %s1092_s26, %s1092_s26 }
   0xd   :  { %p1099_p6 = por %p1098_p5, %p1097_p4 }
   0xf   :  { %p1100_p7 = pnand %p1099_p6, %p1093_p3 }
  0x11   :  { %1103 = shalt.err (!%p1100_p7)
}
  0x12   :  { %21 = dma.hbm_to_vmem [thread:$0]  %s1267_s0, 1024, %s19_s16, [#allocation3]  }
  0x13   :  { %s1104_s5 = scalar_lea.hbm %s1268_s1, 8192 }
  0x14   :  { %p1105_p8 = scmp.ne.s32.totalorder %s1268_s1, %s1104_s5  ;;  %p1108_p9 = scmp.lt.u32.totalorder %s1104_s5, %s1268_s1 }
  0x16   :  { %p1110_p10 = pnand %p1108_p9, %p1105_p8 }
  0x18   :  { %1113 = shalt.err (!%p1110_p10)
}
  0x19   :  { %s1114_s10 = scalar_lea.vmem %s1184_s18, 8192  ;;  %p1119_p12 = scmp.lt.s32.totalorder %s1184_s18, %s1184_s18 }
  0x1a   :  { %p1115_p11 = scmp.ne.s32.totalorder %s1184_s18, %s1114_s10  ;;  %p1120_p13 = scmp.lt.s32.totalorder %s1114_s10, %s1114_s10 }
  0x1c   :  { %p1121_p0 = por %p1120_p13, %p1119_p12 }
  0x1e   :  { %p1122_p1 = pnand %p1121_p0, %p1115_p11 }
  0x20   :  { %1125 = shalt.err (!%p1122_p1)
}
  0x21   :  { %s1156_s0 = smov 64   ;;  %s1157_s11 = smov 4  }
  0x22   :  { %33 = dma.hbm_to_vmem [thread:$0]  %s1268_s1, 8192, %s1184_s18, [#allocation6], %s1156_s0, %s1156_s0, %s1157_s11  }
  0x23   :  { %1148 = dma.done.wait [#allocation3], 1024  }
  0x24   :  { %1149 = vsyncadd [#allocation3], 4294966272 }
  0x25   :  { %1150 = dma.done.wait [#allocation6], 8192  }
  0x26   :  { %1151 = vsyncadd [#allocation6], 4294959104  ;;  %v1010_v0 = vld [vmem:[#allocation5 + $0x40] sm:$0xff]   ;;  %v1014_v4 = vld [vmem:[#allocation5 + $0x48] sm:$0xff]   ;;  %s1158_s16 = smov [#allocation7]  }
  0x27   :  { %v1011_v1 = vld [vmem:[#allocation5 + $0xc0] sm:$0xff]   ;;  %917 = vmatprep.subr.bf16.mxu0 %v1010_v0  ;;  %v1015_v5 = vld [vmem:[#allocation5 + $0xc8] sm:$0xff]   ;;  %v1018_v8 = vld [vmem:[#allocation5 + $0x50] sm:$0xff]   ;;  %s841_s17 = sshll.u32 %s1158_s16, 4  ;;  %s842_s17 = int_to_ptr.vmem [resolvable:$true] %s841_s17 }
  0x28   :  { %v1012_v2 = vld [vmem:[#allocation5] sm:$0xff]   ;;  %939 = vmatprep.subr.bf16.mxu1 %v1011_v1  ;;  %v1016_v6 = vld [vmem:[#allocation5 + $0x8] sm:$0xff]   ;;  %v1019_v9 = vld [vmem:[#allocation5 + $0xd0] sm:$0xff]   ;;  %s1126_s18 = scalar_lea.vmem %s842_s17, 128  ;;  %p1131_p3 = scmp.lt.s32.totalorder %s842_s17, %s842_s17 }
  0x29   :  { %v1013_v3 = vld [vmem:[#allocation5 + $0x80] sm:$0xff]   ;;  %918 = vmatpush3.bf16.msra.mxu0 %v1012_v2  ;;  %v1017_v7 = vld [vmem:[#allocation5 + $0x88] sm:$0xff]   ;;  %v1020_v10 = vld [vmem:[#allocation5 + $0x10] sm:$0xff]   ;;  %p1127_p2 = scmp.ne.s32.totalorder %s842_s17, %s1126_s18  ;;  %p1132_p4 = scmp.lt.s32.totalorder %s1126_s18, %s1126_s18 }
  0x2a   :  { %940 = vmatpush3.bf16.msra.mxu1 %v1013_v3  ;;  %919 = vmatprep.subr.bf16.mxu0 %v1014_v4  ;;  %v1021_v11 = vld [vmem:[#allocation5 + $0x90] sm:$0xff]   ;;  %v1022_v12 = vld [vmem:[#allocation5 + $0x58] sm:$0xff]   ;;  %v1026_v16 = vld [vmem:[#allocation5 + $0x60] sm:$0xff]  }
  0x2b   :  { %941 = vmatprep.subr.bf16.mxu1 %v1015_v5  ;;  %v1023_v13 = vld [vmem:[#allocation5 + $0xd8] sm:$0xff]   ;;  %v1027_v17 = vld [vmem:[#allocation5 + $0xe0] sm:$0xff]   ;;  %v1030_v20 = vld [vmem:[#allocation5 + $0x68] sm:$0xff]   ;;  %p1133_p5 = por %p1132_p4, %p1131_p3 }
  0x2c   :  { %v1024_v14 = vld [vmem:[#allocation5 + $0x18] sm:$0xff]   ;;  %v1028_v18 = vld [vmem:[#allocation5 + $0x20] sm:$0xff]   ;;  %v1031_v21 = vld [vmem:[#allocation5 + $0xe8] sm:$0xff]  }
  0x2d   :  { %920 = vmatpush3.bf16.msra.mxu0 %v1016_v6  ;;  %v1025_v15 = vld [vmem:[#allocation5 + $0x98] sm:$0xff]   ;;  %v1029_v19 = vld [vmem:[#allocation5 + $0xa0] sm:$0xff]   ;;  %v1032_v22 = vld [vmem:[#allocation5 + $0x28] sm:$0xff]   ;;  %p1134_p6 = pnand %p1133_p5, %p1127_p2 }
  0x2e   :  { %942 = vmatpush3.bf16.msra.mxu1 %v1017_v7  ;;  %921 = vmatprep.subr.bf16.mxu0 %v1018_v8  ;;  %v1033_v23 = vld [vmem:[#allocation5 + $0xa8] sm:$0xff]   ;;  %v1034_v24 = vld [vmem:[#allocation5 + $0x70] sm:$0xff]   ;;  %v1038_v28 = vld [vmem:[#allocation5 + $0x78] sm:$0xff]  }
  0x2f   :  { %943 = vmatprep.subr.bf16.mxu1 %v1019_v9  ;;  %v1035_v25 = vld [vmem:[#allocation5 + $0xf0] sm:$0xff]   ;;  %v1039_v29 = vld [vmem:[#allocation5 + $0xf8] sm:$0xff]   ;;  %v1215_v32 = vld [vmem:[#allocation2 + $0x8] sm:$0xff] }
  0x30   :  { %v1036_v26 = vld [vmem:[#allocation5 + $0x30] sm:$0xff]   ;;  %v1040_v30 = vld [vmem:[#allocation5 + $0x38] sm:$0xff]   ;;  %v1217_v34 = vld [vmem:[#allocation2] sm:$0xff]  ;;  %v54_v35 = vpack.c.bf16 %v1215_v32, %v1215_v32 }
  0x31   :  { %922 = vmatpush3.bf16.msra.mxu0 %v1020_v10  ;;  %v1037_v27 = vld [vmem:[#allocation5 + $0xb0] sm:$0xff]   ;;  %v1041_v31 = vld [vmem:[#allocation5 + $0xb8] sm:$0xff]   ;;  %v53_v37 = vpack.c.bf16 %v1217_v34, %v1217_v34  ;;  %v1042_v40 = vld [vmem:[#allocation5 + $0x140] sm:$0xff]   ;;  %v733_v41 = vadd.f32 %v1215_v32, %v1217_v34 }
  0x32   :  { %944 = vmatpush3.bf16.msra.mxu1 %v1021_v11  ;;  %923 = vmatprep.subr.bf16.mxu0 %v1022_v12  ;;  %v48_v33 = vld [vmem:[#allocation2 + $0x18] sm:$0xff]  ;;  %v47_v38 = vld [vmem:[#allocation2 + $0x10] sm:$0xff]  ;;  %v1043_v42 = vld [vmem:[#allocation5 + $0x1c0] sm:$0xff]  }
  0x33   :  { %945 = vmatprep.subr.bf16.mxu1 %v1023_v13  ;;  %v56_v36 = vpack.c.bf16 %v48_v33, %v48_v33  ;;  %v55_v39 = vpack.c.bf16 %v47_v38, %v47_v38  ;;  %605 = vmatprep.mubr.bf16.mxu0 %v54_v35  ;;  %v1044_v43 = vld [vmem:[#allocation5 + $0x100] sm:$0xff]   ;;  %v1046_v45 = vld [vmem:[#allocation5 + $0x148] sm:$0xff]   ;;  %v749_v46 = vadd.f32 %v48_v33, %v47_v38  ;;  %v1050_v52 = vld [vmem:[#allocation5 + $0x150] sm:$0xff]  }
  0x34   :  { %v1045_v44 = vld [vmem:[#allocation5 + $0x180] sm:$0xff]   ;;  %734 = vadd.xlane.f32.xlu0 %v733_v41  ;;  %v753_v47 = vmul.f32 %v47_v38, %v47_v38  ;;  %v754_v48 = vmul.f32 %v48_v33, %v48_v33  ;;  %v1047_v49 = vld [vmem:[#allocation5 + $0x1c8] sm:$0xff]   ;;  %v1051_v54 = vld [vmem:[#allocation5 + $0x1d0] sm:$0xff]  }
  0x35   :  { %924 = vmatpush3.bf16.msra.mxu0 %v1024_v14  ;;  %645 = vmatprep.mubr.bf16.mxu1 %v56_v36  ;;  %v1048_v50 = vld [vmem:[#allocation5 + $0x108] sm:$0xff]   ;;  %v1052_v55 = vld [vmem:[#allocation5 + $0x110] sm:$0xff]   ;;  %v1054_v57 = vld [vmem:[#allocation5 + $0x158] sm:$0xff]  }
  0x36   :  { %946 = vmatpush3.bf16.msra.mxu1 %v1025_v15  ;;  %925 = vmatprep.subr.bf16.mxu0 %v1026_v16  ;;  %v1049_v51 = vld [vmem:[#allocation5 + $0x188] sm:$0xff]   ;;  %v755_v53 = vadd.f32 %v754_v48, %v753_v47  ;;  %v1053_v56 = vld [vmem:[#allocation5 + $0x190] sm:$0xff]   ;;  %v1055_v58 = vld [vmem:[#allocation5 + $0x1d8] sm:$0xff]  }
  0x37   :  { %947 = vmatprep.subr.bf16.mxu1 %v1027_v17  ;;  %v1056_v59 = vld [vmem:[#allocation5 + $0x118] sm:$0xff]   ;;  %v1058_v61 = vld [vmem:[#allocation5 + $0x160] sm:$0xff]   ;;  %v1062_v1 = vld [vmem:[#allocation5 + $0x168] sm:$0xff]  }
  0x38   :  { %750 = vadd.xlane.f32.xlu0 %v749_v46  ;;  %v1057_v60 = vld [vmem:[#allocation5 + $0x198] sm:$0xff]   ;;  %v1059_v62 = vld [vmem:[#allocation5 + $0x1e0] sm:$0xff]   ;;  %v1063_v2 = vld [vmem:[#allocation5 + $0x1e8] sm:$0xff]  }
  0x39   :  { %926 = vmatpush3.bf16.msra.mxu0 %v1028_v18  ;;  %v1060_v63 = vld [vmem:[#allocation5 + $0x120] sm:$0xff]   ;;  %v1064_v3 = vld [vmem:[#allocation5 + $0x128] sm:$0xff]   ;;  %v1066_v5 = vld [vmem:[#allocation5 + $0x170] sm:$0xff]  }
  0x3a   :  { %948 = vmatpush3.bf16.msra.mxu1 %v1029_v19  ;;  %927 = vmatprep.subr.bf16.mxu0 %v1030_v20  ;;  %v1061_v0 = vld [vmem:[#allocation5 + $0x1a0] sm:$0xff]   ;;  %v1065_v4 = vld [vmem:[#allocation5 + $0x1a8] sm:$0xff]   ;;  %v1067_v6 = vld [vmem:[#allocation5 + $0x1f0] sm:$0xff]  }
  0x3b   :  { %949 = vmatprep.subr.bf16.mxu1 %v1031_v21  ;;  %v1068_v7 = vld [vmem:[#allocation5 + $0x130] sm:$0xff]   ;;  %v1070_v9 = vld [vmem:[#allocation5 + $0x178] sm:$0xff]   ;;  %v50_v13 = vld [vmem:[#allocation2 + $0x28] sm:$0xff] }
  0x3c   :  { %756 = vadd.xlane.f32.xlu0 %v755_v53  ;;  %v1069_v8 = vld [vmem:[#allocation5 + $0x1b0] sm:$0xff]   ;;  %v1071_v10 = vld [vmem:[#allocation5 + $0x1f8] sm:$0xff]   ;;  %v58_v15 = vpack.c.bf16 %v50_v13, %v50_v13  ;;  %v49_v17 = vld [vmem:[#allocation2 + $0x20] sm:$0xff]  ;;  %v769_v19 = vmul.f32 %v50_v13, %v50_v13 }
  0x3d   :  { %928 = vmatpush3.bf16.msra.mxu0 %v1032_v22  ;;  %v1072_v11 = vld [vmem:[#allocation5 + $0x138] sm:$0xff]   ;;  %v51_v18 = vld [vmem:[#allocation2 + $0x30] sm:$0xff]  ;;  %v57_v20 = vpack.c.bf16 %v49_v17, %v49_v17  ;;  %v764_v22 = vadd.f32 %v50_v13, %v49_v17 }
  0x3e   :  { %950 = vmatpush3.bf16.msra.mxu1 %v1033_v23  ;;  %929 = vmatprep.subr.bf16.mxu0 %v1034_v24  ;;  %v1073_v12 = vld [vmem:[#allocation5 + $0x1b8] sm:$0xff]   ;;  %v59_v21 = vpack.c.bf16 %v51_v18, %v51_v18  ;;  %v768_v23 = vmul.f32 %v49_v17, %v49_v17 }
  0x3f   :  { %951 = vmatprep.subr.bf16.mxu1 %v1035_v25  ;;  %v52_v14 = vld [vmem:[#allocation2 + $0x38] sm:$0xff]  ;;  %765 = vadd.xlane.f32.xlu1 %v764_v22  ;;  %v738_v25 = vmul.f32 %v1217_v34, %v1217_v34 }
  0x40   :  { %v60_v16 = vpack.c.bf16 %v52_v14, %v52_v14  ;;  %v779_v24 = vadd.f32 %v52_v14, %v51_v18 }
  0x41   :  { %930 = vmatpush3.bf16.msra.mxu0 %v1036_v26  ;;  %v739_v26 = vmul.f32 %v1215_v32, %v1215_v32 }
  0x42   :  { %952 = vmatpush3.bf16.msra.mxu1 %v1037_v27  ;;  %931 = vmatprep.subr.bf16.mxu0 %v1038_v28  ;;  %v770_v27 = vadd.f32 %v769_v19, %v768_v23 }
  0x43   :  { %953 = vmatprep.subr.bf16.mxu1 %v1039_v29  ;;  %780 = vadd.xlane.f32.xlu1 %v779_v24  ;;  %v740_v28 = vadd.f32 %v739_v26, %v738_v25  ;;  %v783_v29 = vmul.f32 %v51_v18, %v51_v18 }
  0x44   :  { %771 = vadd.xlane.f32.xlu0 %v770_v27 }
  0x45   :  { %932 = vmatpush3.bf16.msra.mxu0 %v1040_v30  ;;  %v784_v30 = vmul.f32 %v52_v14, %v52_v14 }
  0x46   :  { %954 = vmatpush3.bf16.msra.mxu1 %v1041_v31  ;;  %961 = vmatprep.subr.bf16.mxu0 %v1042_v40 }
  0x47   :  { %983 = vmatprep.subr.bf16.mxu1 %v1043_v42  ;;  %741 = vadd.xlane.f32.xlu1 %v740_v28  ;;  %v785_v31 = vadd.f32 %v784_v30, %v783_v29  ;;  %v915_v28 = vld [vmem:[%s1269_s2] ss:$0 sm:$0xff] }
  0x48   :  { %606 = vmatmul.mubr.bf16.vlgmr.msra.gmra.mrb[0].mxu0 %v53_v37 }
  0x49   :  { %646 = vmatmul.mubr.bf16.vlgmr.msra.gmra.mrb[0].mxu1 %v55_v39  ;;  %962 = vmatpush3.bf16.msra.mxu0 %v1044_v43 }
  0x4a   :  { %984 = vmatpush3.bf16.msra.mxu1 %v1045_v44  ;;  %963 = vmatprep.subr.bf16.mxu0 %v1046_v45 }
  0x4b   :  { %985 = vmatprep.subr.bf16.mxu1 %v1047_v49  ;;  %685 = vmatprep.mubr.bf16.mxu0 %v58_v15 }
  0x4c   :  { %725 = vmatprep.mubr.bf16.mxu1 %v60_v16  ;;  %786 = vadd.xlane.f32.xlu1 %v785_v31 }
  0x4d   :  { %964 = vmatpush3.bf16.msra.mxu0 %v1048_v50 }
  0x4e   :  { %986 = vmatpush3.bf16.msra.mxu1 %v1049_v51  ;;  %965 = vmatprep.subr.bf16.mxu0 %v1050_v52 }
  0x4f   :  { %987 = vmatprep.subr.bf16.mxu1 %v1051_v54 }
  0x51   :  { %966 = vmatpush3.bf16.msra.mxu0 %v1052_v55 }
  0x52   :  { %988 = vmatpush3.bf16.msra.mxu1 %v1053_v56  ;;  %967 = vmatprep.subr.bf16.mxu0 %v1054_v57 }
  0x53   :  { %989 = vmatprep.subr.bf16.mxu1 %v1055_v58 }
  0x55   :  { %968 = vmatpush3.bf16.msra.mxu0 %v1056_v59 }
  0x56   :  { %990 = vmatpush3.bf16.msra.mxu1 %v1057_v60  ;;  %969 = vmatprep.subr.bf16.mxu0 %v1058_v61 }
  0x57   :  { %991 = vmatprep.subr.bf16.mxu1 %v1059_v62 }
  0x59   :  { %970 = vmatpush3.bf16.msra.mxu0 %v1060_v63 }
  0x5a   :  { %992 = vmatpush3.bf16.msra.mxu1 %v1061_v0  ;;  %971 = vmatprep.subr.bf16.mxu0 %v1062_v1 }
  0x5b   :  { %993 = vmatprep.subr.bf16.mxu1 %v1063_v2 }
  0x5d   :  { %972 = vmatpush3.bf16.msra.mxu0 %v1064_v3 }
  0x5e   :  { %994 = vmatpush3.bf16.msra.mxu1 %v1065_v4  ;;  %973 = vmatprep.subr.bf16.mxu0 %v1066_v5  ;;  %v794_v4 = vlaneseq }
  0x5f   :  { %995 = vmatprep.subr.bf16.mxu1 %v1067_v6 }
  0x61   :  { %974 = vmatpush3.bf16.msra.mxu0 %v1068_v7 }
  0x62   :  { %996 = vmatpush3.bf16.msra.mxu1 %v1069_v8  ;;  %975 = vmatprep.subr.bf16.mxu0 %v1070_v9  ;;  %v795_v9 = vand.u32 127, %v794_v4 }
  0x63   :  { %997 = vmatprep.subr.bf16.mxu1 %v1071_v10 }
  0x64   :  { %vm797_vm0 = vcmp.lt.s32.totalorder %v795_v9, 32  ;;  %vm801_vm1 = vcmp.ge.s32.totalorder %v795_v9, 32  ;;  %vm802_vm2 = vcmp.lt.s32.totalorder %v795_v9, 64  ;;  %vm806_vm4 = vcmp.ge.s32.totalorder %v795_v9, 64 }
  0x65   :  { %976 = vmatpush3.bf16.msra.mxu0 %v1072_v11  ;;  %vm1230_vm3 = vmand %vm801_vm1, %vm802_vm2  ;;  %vm807_vm5 = vcmp.lt.s32.totalorder %v795_v9, 96  ;;  %vm811_vm7 = vcmp.ge.s32.totalorder %v795_v9, 96 }
  0x66   :  { %998 = vmatpush3.bf16.msra.mxu1 %v1073_v12  ;;  %vm1236_vm6 = vmand %vm806_vm4, %vm807_vm5 }
  0x68   :  { %686 = vmatmul.mubr.bf16.vlgmr.msra.gmra.mrb[4].mxu0 %v57_v20 }
  0x69   :  { %726 = vmatmul.mubr.bf16.vlgmr.msra.gmra.mrb[4].mxu1 %v59_v21 }
  0xc1   :  { %v735_v33 = vpop.xlane.xlu0 %734 }
  0xc2   :  { %v737_v34 = vmul.f32 0.00390625, %v735_v33 }
  0xc4   :  { %v744_v50 = vmul.f32 %v737_v34, %v737_v34  ;;  %v799_v13 = vsel %vm797_vm0, %v737_v34, 0.0 }
  0xc5   :  { %v751_v36 = vpop.xlane.xlu0 %750 }
  0xc6   :  { %v752_v48 = vmul.f32 0.00390625, %v751_v36 }
  0xc8   :  { %v759_v54 = vmul.f32 %v752_v48, %v752_v48  ;;  %v804_v16 = vsel %vm1230_vm3, %v752_v48, %v799_v13 }
  0xc9   :  { %v757_v38 = vpop.xlane.xlu0 %756 }
  0xca   :  { %v758_v55 = vmul.f32 0.00390625, %v757_v38 }
  0xcc   :  { %v766_v35 = vpop.xlane.xlu1 %765  ;;  %v760_v62 = vsub.f32 %v758_v55, %v759_v54 }
  0xcd   :  { %v767_v53 = vmul.f32 0.00390625, %v766_v35 }
  0xce   :  { %v761_v3 = vmax.f32 %v760_v62, 0.0 }
  0xcf   :  { %v774_v59 = vmul.f32 %v767_v53, %v767_v53  ;;  %v809_v19 = vsel %vm1236_vm6, %v767_v53, %v804_v16 }
  0xd0   :  { %v781_v37 = vpop.xlane.xlu1 %780  ;;  %v762_v8 = vadd.f32 1e-05, %v761_v3 }
  0xd1   :  { %v772_v56 = vpop.xlane.xlu0 %771  ;;  %v782_v58 = vmul.f32 0.00390625, %v781_v37 }
  0xd2   :  { %v773_v60 = vmul.f32 0.00390625, %v772_v56 }
  0xd3   :  { %v789_v0 = vmul.f32 %v782_v58, %v782_v58  ;;  %v814_v29 = vsel %vm811_vm7, %v782_v58, %v809_v19 }
  0xd4   :  { %v742_v39 = vpop.xlane.xlu1 %741  ;;  %v775_v2 = vsub.f32 %v773_v60, %v774_v59 }
  0xd5   :  { %v743_v52 = vmul.f32 0.00390625, %v742_v39  ;;  %v823_v39 = vmul.f32 %v915_v28, %v814_v29 }
  0xd6   :  { %v776_v7 = vmax.f32 %v775_v2, 0.0 }
  0xd7   :  { %v745_v57 = vsub.f32 %v743_v52, %v744_v50 }
  0xd8   :  { %v777_v11 = vadd.f32 1e-05, %v776_v7 }
  0xd9   :  { %v787_v61 = vpop.xlane.xlu1 %786  ;;  %v746_v63 = vmax.f32 %v745_v57, 0.0 }
  0xda   :  { %v788_v1 = vmul.f32 0.00390625, %v787_v61 }
  0xdb   :  { %v747_v5 = vadd.f32 1e-05, %v746_v63 }
  0xdc   :  { %v790_v6 = vsub.f32 %v788_v1, %v789_v0 }
  0xdd   :  { %1074 = vrsqrt.f32 %v747_v5 }
  0xde   :  { %v791_v10 = vmax.f32 %v790_v6, 0.0  ;;  %1076 = vrsqrt.f32 %v762_v8 }
  0xdf   :  { %1078 = vrsqrt.f32 %v777_v11 }
  0xe0   :  { %v792_v12 = vadd.f32 1e-05, %v791_v10 }
  0xe2   :  { %1080 = vrsqrt.f32 %v792_v12 }
  0xe7   :  { %v1075_v15 = vpop.eup %1074 }
  0xe8   :  { %v1077_v18 = vpop.eup %1076  ;;  %v800_v21 = vsel %vm797_vm0, %v1075_v15, 0.0 }
  0xe9   :  { %v1079_v27 = vpop.eup %1078  ;;  %v805_v35 = vsel %vm1230_vm3, %v1077_v18, %v800_v21 }
  0xec   :  { %v1081_v38 = vpop.eup %1080 }
 0x11b   :  { %v933_v40 = vpop.f32.mrb[0].mxu0 }
 0x11c   :  { %v955_v41 = vpop.f32.mrb[0].mxu1  ;;  %v934_v32 = vpop.f32.mrb[1].mxu0 }
 0x11d   :  { %v956_v42 = vpop.f32.mrb[1].mxu1  ;;  %v935_v43 = vadd.f32 %v934_v32, %v933_v40  ;;  %v936_v45 = vpop.f32.mrb[2].mxu0  ;;  %v810_v40 = vsel %vm1236_vm6, %v1079_v27, %v805_v35 }
 0x11e   :  { %v957_v44 = vadd.f32 %v956_v42, %v955_v41  ;;  %v958_v46 = vpop.f32.mrb[2].mxu1  ;;  %v937_v49 = vpop.f32.mrb[3].mxu0  ;;  %v815_v32 = vsel %vm811_vm7, %v1081_v38, %v810_v40  ;;  %v916_v42 = vld [vmem:[%s1270_s3] ss:$0 sm:$0xff] }
 0x11f   :  { %v959_v47 = vpop.f32.mrb[3].mxu1 }
 0x120   :  { %v648_v51 = vadd.f32 %v957_v44, %v935_v43 }
 0x13b   :  { %v977_v20 = vpop.f32.mrb[4].mxu0 }
 0x13c   :  { %v999_v22 = vpop.f32.mrb[4].mxu1  ;;  %v978_v23 = vpop.f32.mrb[5].mxu0 }
 0x13d   :  { %v979_v24 = vadd.f32 %v978_v23, %v977_v20  ;;  %v1000_v25 = vpop.f32.mrb[5].mxu1  ;;  %v980_v26 = vpop.f32.mrb[6].mxu0 }
 0x13e   :  { %v1001_v30 = vadd.f32 %v1000_v25, %v999_v22  ;;  %v1002_v31 = vpop.f32.mrb[6].mxu1  ;;  %v981_v33 = vpop.f32.mrb[7].mxu0 }
 0x13f   :  { %v688_v36 = vadd.f32 %v979_v24, %v648_v51  ;;  %v1003_v37 = vpop.f32.mrb[7].mxu1 }
 0x141   :  { %v728_v34 = vadd.f32 %v1001_v30, %v688_v36 }
 0x143   :  { %v824_v41 = vsub.f32 %v728_v34, %v823_v39 }
 0x145   :  { %v825_v43 = vmul.f32 %v824_v41, %v815_v32 }
 0x147   :  { %v833_v44 = vadd.f32 %v916_v42, %v825_v43 }
 0x149   :  { %834 = vst [vmem:[#allocation7] sm:$0xff] %v833_v44 }
 0x14a   :  { %1137 = shalt.err (!%p1134_p6)
}
 0x14b   :  { %s1138_s21 = scalar_lea.hbm %s1271_s4, 128 }
 0x14c   :  { %p1139_p7 = scmp.ne.s32.totalorder %s1271_s4, %s1138_s21  ;;  %p1142_p8 = scmp.lt.u32.totalorder %s1138_s21, %s1271_s4 }
 0x14e   :  { %p1144_p9 = pnand %p1142_p8, %p1139_p7 }
 0x150   :  { %1147 = shalt.err (!%p1144_p9)
}
 0x151   :  { %844 = dma.vmem_to_hbm [thread:$0]  %s842_s17, 128, %s1271_s4, [#allocation4]  }
 0x152   :  { %1152 = dma.done.wait [#allocation4], 128  }
 0x153   :  { %1153 = vsyncadd [#allocation4], 4294967168 }
 0x154   :  { %848 = vsyncpa [#allocation3], 1 }
 0x155   :  { %849 = vsyncpa [#allocation6], 1 }
 0x156   :  { %850 = vsyncpa [#allocation4], 1 }

</bundles_post_ra>
